<compile_context>
chip_gen: v7x
topology: tpu7x:2x2x1
jax: 0.10.0
libtpu: 0.0.40
codegen_flags: <defaults>
</compile_context>

<pallas_src>
import numpy as np
import jax
import jax.numpy as jnp
from jax.experimental import pallas as pl
from jax.experimental.pallas import tpu as pltpu

EPS = 1e-5        # nn.LayerNorm default eps
NEG_INF = -1e30   # mask value for padded keys


# -----------------------------------------------------------------------------
# Small helpers
# -----------------------------------------------------------------------------
def _round_up(x, m):
    return ((x + m - 1) // m) * m


def _pick_tile(n, cap=512):
    """Largest query-tile <= cap that divides n.

    Guarantees the tile is either a multiple of 8 (sublane-aligned) or the full
    extent n, so the (8, 128) BlockSpec constraint is always satisfied.
    """
    if n <= cap:
        return n
    for t in range(cap - (cap % 8), 7, -8):
        if n % t == 0:
            return t
    return n   # no sublane-aligned divisor: fall back to the full extent


def _layernorm(x, g, b):
    # Single-pass variance E[x^2] - mean^2 (one fewer cross-lane reduction).
    mean = jnp.mean(x, axis=-1, keepdims=True)
    var = jnp.mean(x * x, axis=-1, keepdims=True) - mean * mean
    return (x - mean) * jax.lax.rsqrt(var + EPS) * g + b


# -----------------------------------------------------------------------------
# Fused cross-attention kernel (LN(q-input) -> Q/K/V -> MHA -> proj)
# -----------------------------------------------------------------------------
def make_cross_attn_kernel(num_heads, scale, m_true, m_pad):
    def kernel(x_ref, r_ref, rg_ref, rb_ref, g_ref, b_ref,
               wq_ref, wk_ref, wv_ref, wp_ref, bp_ref,
               o_ref, k_sc, v_sc, acc_sc):
        qt = pl.program_id(1)

        # Hoisted per-batch work: ref LayerNorm + K/V projections, computed once
        # per batch element (query-tile grid axis is "arbitrary" so the VMEM
        # scratch persists across the inner query-tile iterations).
        @pl.when(qt == 0)
        def _():
            r = _layernorm(r_ref[0].astype(jnp.float32), rg_ref[...], rb_ref[...])
            r16 = r.astype(jnp.bfloat16)
            k_sc[...] = jnp.dot(r16, wk_ref[...],
                                preferred_element_type=jnp.float32).astype(jnp.bfloat16)
            v_sc[...] = jnp.dot(r16, wv_ref[...],
                                preferred_element_type=jnp.float32).astype(jnp.bfloat16)

        x = x_ref[0].astype(jnp.float32)                               # (TN, C)
        xn = _layernorm(x, g_ref[...], b_ref[...]).astype(jnp.bfloat16)
        q = jnp.dot(xn, wq_ref[...], preferred_element_type=jnp.float32)  # (TN, C) f32
        # Fold the attention scale into Q once (smaller tile than the logits).
        q16 = (q * scale).astype(jnp.bfloat16)

        c = q16.shape[-1]
        d = c // num_heads
        k = k_sc[...]                                                  # (M_pad, C) bf16
        v = v_sc[...]                                                  # (M_pad, C) bf16

        if m_true < m_pad:
            key_valid = jax.lax.broadcasted_iota(jnp.int32, (1, m_pad), 1) < m_true
        else:
            key_valid = None

        # Per-head attention; each head writes straight into its lane slice of
        # the fp32 accumulator (no concatenate, bounded live ranges).
        for h in range(num_heads):
            sl = slice(h * d, (h + 1) * d)
            logits = jax.lax.dot_general(
                q16[:, sl], k[:, sl], (((1,), (1,)), ((), ())),
                preferred_element_type=jnp.float32)                    # (TN, M_pad)
            if key_valid is not None:
                logits = jnp.where(key_valid, logits, NEG_INF)
            mx = jnp.max(logits, axis=-1, keepdims=True)
            p = jnp.exp(logits - mx)
            denom = jnp.sum(p, axis=-1, keepdims=True)
            p = p * pl.reciprocal(denom, approx=True)                  # EUP, not VPU divide
            acc_sc[:, sl] = jnp.dot(p.astype(jnp.bfloat16), v[:, sl],
                                    preferred_element_type=jnp.float32)

        o = acc_sc[...].astype(jnp.bfloat16)                           # (TN, C)
        o_ref[0] = (jnp.dot(o, wp_ref[...], preferred_element_type=jnp.float32)
                    + bp_ref[...]).astype(o_ref.dtype)

    return kernel


def cross_attention(x, ref, ref_g, ref_b, p, num_heads):
    B, N, C = x.shape
    _, M, Cr = ref.shape
    M_pad = _round_up(M, 128)                      # lane-dense logits / K-V rows
    if M_pad != M:
        ref = jnp.pad(ref, ((0, 0), (0, M_pad - M), (0, 0)))

    TN = _pick_tile(N)
    NT = N // TN
    d = C // num_heads
    scale = float(d) ** -0.5

    # bf16 weights: halves weight DMA, feeds the MXU at native width.
    wq = p['wq'].astype(jnp.bfloat16)
    wk = p['wk'].astype(jnp.bfloat16)
    wv = p['wv'].astype(jnp.bfloat16)
    wp = p['wp'].astype(jnp.bfloat16)

    kernel = make_cross_attn_kernel(num_heads, scale, M, M_pad)

    flops = int(2 * B * (2 * N * C * C + 2 * M * Cr * C + 2 * N * M_pad * C))
    bytes_accessed = int(x.size * 4 + ref.size * 4 + B * N * C * 4
                         + 2 * (wq.size + wk.size + wv.size + wp.size))
    cost = pl.CostEstimate(flops=flops, transcendentals=int(B * N * M_pad),
                           bytes_accessed=bytes_accessed)

    tok_spec = pl.BlockSpec((1, TN, C), lambda b, q: (b, q, 0))
    const = lambda b, q: (0, 0)

    return pl.pallas_call(
        kernel,
        out_shape=jax.ShapeDtypeStruct((B, N, C), x.dtype),
        grid=(B, NT),
        in_specs=[
            tok_spec,                                          # x (query tokens)
            pl.BlockSpec((1, M_pad, Cr), lambda b, q: (b, 0, 0)),  # raw ref tokens
            pl.BlockSpec((1, Cr), const),                      # ref LN gamma
            pl.BlockSpec((1, Cr), const),                      # ref LN beta
            pl.BlockSpec((1, C), const),                       # q LN gamma
            pl.BlockSpec((1, C), const),                       # q LN beta
            pl.BlockSpec((C, C), const),                       # wq
            pl.BlockSpec((Cr, C), const),                      # wk
            pl.BlockSpec((Cr, C), const),                      # wv
            pl.BlockSpec((C, C), const),                       # wp
            pl.BlockSpec((1, C), const),                       # proj bias
        ],
        out_specs=tok_spec,
        scratch_shapes=[
            pltpu.VMEM((M_pad, C), jnp.bfloat16),              # K (per-batch, hoisted)
            pltpu.VMEM((M_pad, C), jnp.bfloat16),              # V (per-batch, hoisted)
            pltpu.VMEM((TN, C), jnp.float32),                  # per-head accumulator
        ],
        compiler_params=pltpu.CompilerParams(
            dimension_semantics=("parallel", "arbitrary")),
        cost_estimate=cost,
    )(x, ref, ref_g, ref_b, p['ln_g'], p['ln_b'], wq, wk, wv, wp, p['bp'])


# -----------------------------------------------------------------------------
# Fused multi-granularity 'add' + LayerNorm + Mlp + residual kernel
# -----------------------------------------------------------------------------
def make_mlp_kernel(n_add):
    def kernel(*refs):
        x_refs = refs[:n_add]
        g_ref, b_ref, w1_ref, b1_ref, w2_ref, b2_ref, o_ref = refs[n_add:n_add + 7]
        x = x_refs[0][0].astype(jnp.float32)
        for r in x_refs[1:]:                       # multi-gran 'add' fusion
            x = x + r[0].astype(jnp.float32)
        xn = _layernorm(x, g_ref[...], b_ref[...]).astype(jnp.bfloat16)
        h = jnp.dot(xn, w1_ref[...], preferred_element_type=jnp.float32) + b1_ref[...]
        h = jnp.maximum(h, 0.0).astype(jnp.bfloat16)          # ReLU
        y = jnp.dot(h, w2_ref[...], preferred_element_type=jnp.float32) + b2_ref[...]
        o_ref[0] = (x + y).astype(o_ref.dtype)
    return kernel


def mlp_residual_fused(xs, p):
    """out = s + Mlp(LayerNorm(s)) with s = sum(xs), fully fused."""
    B, N, C = xs[0].shape
    Dh = p['w1'].shape[1]
    TN = _pick_tile(N)
    NT = N // TN
    n_add = len(xs)

    w1 = p['w1'].astype(jnp.bfloat16)
    w2 = p['w2'].astype(jnp.bfloat16)

    tok_spec = pl.BlockSpec((1, TN, C), lambda b, q: (b, q, 0))
    const = lambda b, q: (0, 0)

    flops = int(2 * B * N * (C * Dh + Dh * C))
    bytes_accessed = int((n_add + 1) * B * N * C * 4 + 2 * (w1.size + w2.size))
    cost = pl.CostEstimate(flops=flops, transcendentals=0,
                           bytes_accessed=bytes_accessed)

    return pl.pallas_call(
        make_mlp_kernel(n_add),
        out_shape=jax.ShapeDtypeStruct((B, N, C), xs[0].dtype),
        grid=(B, NT),
        in_specs=[tok_spec] * n_add + [
            pl.BlockSpec((1, C), const),                       # LN gamma
            pl.BlockSpec((1, C), const),                       # LN beta
            pl.BlockSpec((C, Dh), const),                      # w1
            pl.BlockSpec((1, Dh), const),                      # b1
            pl.BlockSpec((Dh, C), const),                      # w2
            pl.BlockSpec((1, C), const),                       # b2
        ],
        out_specs=tok_spec,
        compiler_params=pltpu.CompilerParams(
            dimension_semantics=("parallel", "parallel")),
        cost_estimate=cost,
    )(*xs, p['ln_g'], p['ln_b'], w1, p['b1'], w2, p['b2'])


# -----------------------------------------------------------------------------
# JAX glue: unfold / fold / reshape_out (pure data rearrangement, no compute)
# -----------------------------------------------------------------------------
def unfold(x_img, k):
    # matches nn.Unfold(kernel_size=k, stride=k) followed by .permute(0, 2, 1)
    B, C, H, W = x_img.shape
    p = x_img.reshape(B, C, H // k, k, W // k, k)
    p = p.transpose(0, 2, 4, 1, 3, 5)             # (B, oh, ow, C, kh, kw)
    return p.reshape(B, (H // k) * (W // k), C * k * k)


def fold(cols, k, H, W):
    # matches nn.Fold(output_size=(H, W), kernel_size=k, stride=k) on (B, C*k*k, L)
    B, L, Ck = cols.shape
    C = Ck // (k * k)
    p = cols.reshape(B, H // k, W // k, C, k, k)
    p = p.transpose(0, 3, 1, 4, 2, 5)             # (B, C, oh, kh, ow, kw)
    return p.reshape(B, C, H, W)


def reshape_out(x_img):
    B, C, H, W = x_img.shape
    return x_img.transpose(0, 2, 3, 1).reshape(B, H * W, C)


# -----------------------------------------------------------------------------
# Full forward (keep_init=True, multi_gran_opt='add', drop_path=0)
# -----------------------------------------------------------------------------
def multi_gran_cross_transformer(x, ref_x, params, *, num_heads, num_levels,
                                 start_level, input_resolution):
    B, N, C = x.shape
    R = input_resolution
    x_img = x.transpose(0, 2, 1).reshape(B, C, R, R)                # NCHW view

    branch_outs = []
    for idx, i in enumerate(range(start_level, num_levels)):
        k = 2 ** i
        cols = unfold(x_img, k)                                     # (B, L, C*k*k)
        attn = cross_attention(cols, ref_x, params['ref_g'], params['ref_b'],
                               params['levels'][idx], num_heads)
        branch_outs.append(reshape_out(fold(attn, k, R, R)))        # (B, H*W, C)

    x0 = cross_attention(x, ref_x, params['ref_g'], params['ref_b'],
                         params['init'], num_heads)                 # keep_init path
    # 'add' fusion + norm2 + Mlp + residual, all inside one kernel.
    return mlp_residual_fused([x0] + branch_outs, params['mlp'])


# -----------------------------------------------------------------------------
# Pure-JAX fp32 reference (mirrors the PyTorch semantics)
# -----------------------------------------------------------------------------
def _ref_ln(x, g, b):
    mean = x.mean(-1, keepdims=True)
    var = ((x - mean) ** 2).mean(-1, keepdims=True)
    return (x - mean) / jnp.sqrt(var + EPS) * g + b


def _ref_cross_attn(x, ref, p, num_heads):
    B, N, C = x.shape
    d = C // num_heads
    scale = d ** -0.5
    xn = _ref_ln(x, p['ln_g'], p['ln_b'])
    q = (xn @ p['wq']).reshape(B, N, num_heads, d).transpose(0, 2, 1, 3)
    k = (ref @ p['wk']).reshape(B, -1, num_heads, d).transpose(0, 2, 1, 3)
    v = (ref @ p['wv']).reshape(B, -1, num_heads, d).transpose(0, 2, 1, 3)
    attn = jax.nn.softmax((q @ k.transpose(0, 1, 3, 2)) * scale, axis=-1)
    o = (attn @ v).transpose(0, 2, 1, 3).reshape(B, N, C)
    return o @ p['wp'] + p['bp']


def reference_forward(x, ref_x, params, *, num_heads, num_levels, start_level,
                      input_resolution):
    B, N, C = x.shape
    R = input_resolution
    ref_n = _ref_ln(ref_x, params['ref_g'], params['ref_b'])
    x_img = x.transpose(0, 2, 1).reshape(B, C, R, R)
    x_splits = []
    for idx, i in enumerate(range(start_level, num_levels)):
        k = 2 ** i
        cols = unfold(x_img, k)
        attn = _ref_cross_attn(cols, ref_n, params['levels'][idx], num_heads)
        x_splits.append(reshape_out(fold(attn, k, R, R)))
    x0 = _ref_cross_attn(x, ref_n, params['init'], num_heads)
    if x_splits:
        x0 = x0 + sum(x_splits)
    p = params['mlp']
    xn = _ref_ln(x0, p['ln_g'], p['ln_b'])
    y = jnp.maximum(xn @ p['w1'] + p['b1'], 0.0) @ p['w2'] + p['b2']
    return x0 + y


# -----------------------------------------------------------------------------
# Deterministic parameter init (synthetic weights, fp32 master copies)
# -----------------------------------------------------------------------------
def init_params(key, dim, ref_dim, num_levels, start_level, mlp_ratio):
    keys = list(jax.random.split(key, 64))
    it = iter(keys)

    def w(shape, scale=0.02):
        return (scale * jax.random.normal(next(it), shape)).astype(jnp.float32)

    def attn_params(d):
        return dict(ln_g=jnp.ones((1, d), jnp.float32),
                    ln_b=jnp.zeros((1, d), jnp.float32),
                    wq=w((d, d)), wk=w((ref_dim, d)), wv=w((ref_dim, d)),
                    wp=w((d, d)), bp=w((1, d)))

    params = dict(
        ref_g=jnp.ones((1, ref_dim), jnp.float32),
        ref_b=jnp.zeros((1, ref_dim), jnp.float32),
        init=attn_params(dim),
        levels=[attn_params(dim * (2 ** i) ** 2)
                for i in range(start_level, num_levels)],
    )
    hidden = int(dim * mlp_ratio)
    params['mlp'] = dict(ln_g=jnp.ones((1, dim), jnp.float32),
                         ln_b=jnp.zeros((1, dim), jnp.float32),
                         w1=w((dim, hidden)), b1=w((1, hidden)),
                         w2=w((hidden, dim)), b2=w((1, dim)))
    return params


# -----------------------------------------------------------------------------
if __name__ == "__main__":
    dim, ref_dim, num_heads = 16, 32, 2
    num_levels, start_level = 2, 1
    input_resolution = 8
    B, M = 2, 8
    N = input_resolution * input_resolution

    key = jax.random.PRNGKey(0)
    kx, kr, kp = jax.random.split(key, 3)
    x = jax.random.normal(kx, (B, N, dim), jnp.float32)
    ref_x = jax.random.normal(kr, (B, M, ref_dim), jnp.float32)
    params = init_params(kp, dim, ref_dim, num_levels, start_level, mlp_ratio=1.0)

    out = multi_gran_cross_transformer(
        x, ref_x, params, num_heads=num_heads, num_levels=num_levels,
        start_level=start_level, input_resolution=input_resolution)
    out = jax.block_until_ready(out)

    ref_out = reference_forward(
        x, ref_x, params, num_heads=num_heads, num_levels=num_levels,
        start_level=start_level, input_resolution=input_resolution)
    # bf16 MXU inputs in the kernel vs fp32 reference -> loosened tolerances.
    np.testing.assert_allclose(np.asarray(out), np.asarray(ref_out),
                               rtol=2e-2, atol=2e-2)
    assert out.shape == (B, N, dim)
    print("KERNEL_OK")
</pallas_src>

<mosaic_0001>
module attributes {stable_mosaic.version = 11 : i64} {
  func.func @kernel(%arg0: i32, %arg1: i32, %arg2: memref<1x16x64xf32, #tpu.memory_space<vmem>>, %arg3: memref<1x128x32xf32, #tpu.memory_space<vmem>>, %arg4: memref<1x32xf32, #tpu.memory_space<vmem>>, %arg5: memref<1x32xf32, #tpu.memory_space<vmem>>, %arg6: memref<1x64xf32, #tpu.memory_space<vmem>>, %arg7: memref<1x64xf32, #tpu.memory_space<vmem>>, %arg8: memref<64x64xbf16, #tpu.memory_space<vmem>>, %arg9: memref<32x64xbf16, #tpu.memory_space<vmem>>, %arg10: memref<32x64xbf16, #tpu.memory_space<vmem>>, %arg11: memref<64x64xbf16, #tpu.memory_space<vmem>>, %arg12: memref<1x64xf32, #tpu.memory_space<vmem>>, %arg13: memref<1x16x64xf32, #tpu.memory_space<vmem>>, %arg14: memref<128x64xbf16, #tpu.memory_space<vmem>>, %arg15: memref<128x64xbf16, #tpu.memory_space<vmem>>, %arg16: memref<16x64xf32, #tpu.memory_space<vmem>>) attributes {dimension_semantics = [#tpu.dimension_semantics<parallel>, #tpu.dimension_semantics<arbitrary>], iteration_bounds = array<i64: 2, 1>, scalar_prefetch = 0 : i64, scratch_operands = 3 : i64, tpu.core_type = #tpu.core_type<tc>, window_params = [{transform_indices = @transform_0, window_bounds = array<i64: 1, 16, 64>}, {transform_indices = @transform_1, window_bounds = array<i64: 1, 128, 32>}, {pipeline_mode = #tpu.pipeline_mode<synchronous>, transform_indices = @transform_2, window_bounds = array<i64: 1, 32>}, {pipeline_mode = #tpu.pipeline_mode<synchronous>, transform_indices = @transform_3, window_bounds = array<i64: 1, 32>}, {pipeline_mode = #tpu.pipeline_mode<synchronous>, transform_indices = @transform_4, window_bounds = array<i64: 1, 64>}, {pipeline_mode = #tpu.pipeline_mode<synchronous>, transform_indices = @transform_5, window_bounds = array<i64: 1, 64>}, {pipeline_mode = #tpu.pipeline_mode<synchronous>, transform_indices = @transform_6, window_bounds = array<i64: 64, 64>}, {pipeline_mode = #tpu.pipeline_mode<synchronous>, transform_indices = @transform_7, window_bounds = array<i64: 32, 64>}, {pipeline_mode = #tpu.pipeline_mode<synchronous>, transform_indices = @transform_8, window_bounds = array<i64: 32, 64>}, {pipeline_mode = #tpu.pipeline_mode<synchronous>, transform_indices = @transform_9, window_bounds = array<i64: 64, 64>}, {pipeline_mode = #tpu.pipeline_mode<synchronous>, transform_indices = @transform_10, window_bounds = array<i64: 1, 64>}, {transform_indices = @transform_11, window_bounds = array<i64: 1, 16, 64>}]} {
    %c0_i32 = arith.constant 0 : i32
    %0 = arith.cmpi eq, %arg1, %c0_i32 : i32
    %1 = arith.extui %0 : i1 to i32
    %c0_i32_0 = arith.constant 0 : i32
    %2 = arith.cmpi ne, %1, %c0_i32_0 : i32
    scf.if %2 {
      %c0_42 = arith.constant 0 : index
      %c0_43 = arith.constant 0 : index
      %c0_44 = arith.constant 0 : index
      %92 = vector.load %arg3[%c0_42, %c0_43, %c0_44] : memref<1x128x32xf32, #tpu.memory_space<vmem>>, vector<1x128x32xf32>
      %93 = vector.shape_cast %92 : vector<1x128x32xf32> to vector<128x32xf32>
      %c0_45 = arith.constant 0 : index
      %c0_46 = arith.constant 0 : index
      %94 = vector.load %arg4[%c0_45, %c0_46] : memref<1x32xf32, #tpu.memory_space<vmem>>, vector<1x32xf32>
      %c0_47 = arith.constant 0 : index
      %c0_48 = arith.constant 0 : index
      %95 = vector.load %arg5[%c0_47, %c0_48] : memref<1x32xf32, #tpu.memory_space<vmem>>, vector<1x32xf32>
      %cst_49 = arith.constant dense<0.000000e+00> : vector<128xf32>
      %96 = vector.multi_reduction <add>, %93, %cst_49 [1] : vector<128x32xf32> to vector<128xf32>
      %97 = vector.shape_cast %96 : vector<128xf32> to vector<128x1xf32>
      %cst_50 = arith.constant 3.200000e+01 : f32
      %98 = vector.broadcast %cst_50 : f32 to vector<128x1xf32>
      %99 = arith.divf %97, %98 : vector<128x1xf32>
      %100 = arith.mulf %93, %93 : vector<128x32xf32>
      %cst_51 = arith.constant dense<0.000000e+00> : vector<128xf32>
      %101 = vector.multi_reduction <add>, %100, %cst_51 [1] : vector<128x32xf32> to vector<128xf32>
      %102 = vector.shape_cast %101 : vector<128xf32> to vector<128x1xf32>
      %cst_52 = arith.constant 3.200000e+01 : f32
      %103 = vector.broadcast %cst_52 : f32 to vector<128x1xf32>
      %104 = arith.divf %102, %103 : vector<128x1xf32>
      %105 = arith.mulf %99, %99 : vector<128x1xf32>
      %106 = arith.subf %104, %105 : vector<128x1xf32>
      %107 = vector.broadcast %99 : vector<128x1xf32> to vector<128x32xf32>
      %108 = arith.subf %93, %107 : vector<128x32xf32>
      %cst_53 = arith.constant 9.99999974E-6 : f32
      %109 = vector.broadcast %cst_53 : f32 to vector<128x1xf32>
      %110 = arith.addf %106, %109 : vector<128x1xf32>
      %111 = math.rsqrt %110 : vector<128x1xf32>
      %112 = vector.broadcast %111 : vector<128x1xf32> to vector<128x32xf32>
      %113 = arith.mulf %108, %112 : vector<128x32xf32>
      %114 = vector.broadcast %94 : vector<1x32xf32> to vector<128x32xf32>
      %115 = arith.mulf %113, %114 : vector<128x32xf32>
      %116 = vector.broadcast %95 : vector<1x32xf32> to vector<128x32xf32>
      %117 = arith.addf %115, %116 : vector<128x32xf32>
      %118 = arith.truncf %117 : vector<128x32xf32> to vector<128x32xbf16>
      %c0_54 = arith.constant 0 : index
      %c0_55 = arith.constant 0 : index
      %119 = vector.load %arg9[%c0_54, %c0_55] : memref<32x64xbf16, #tpu.memory_space<vmem>>, vector<32x64xbf16>
      %cst_56 = arith.constant dense<0.000000e+00> : vector<128x64xf32>
      %120 = tpu.matmul %118, %119, %cst_56 {dimension_numbers = #tpu.dot_dimension_numbers<[1], [0], [0], [1], [0, 0, 1, 1], [], []>} : vector<128x32xbf16>, vector<32x64xbf16>, vector<128x64xf32> -> vector<128x64xf32>
      %121 = arith.truncf %120 : vector<128x64xf32> to vector<128x64xbf16>
      %c0_57 = arith.constant 0 : index
      %c0_58 = arith.constant 0 : index
      %122 = vector.load %arg14[%c0_57, %c0_58] : memref<128x64xbf16, #tpu.memory_space<vmem>>, vector<128x64xbf16>
      tpu.vector_store %arg14[%c0_57, %c0_58], %121 {strides = array<i32>} : memref<128x64xbf16, #tpu.memory_space<vmem>>, vector<128x64xbf16>,
      %c0_59 = arith.constant 0 : index
      %c0_60 = arith.constant 0 : index
      %123 = vector.load %arg10[%c0_59, %c0_60] : memref<32x64xbf16, #tpu.memory_space<vmem>>, vector<32x64xbf16>
      %cst_61 = arith.constant dense<0.000000e+00> : vector<128x64xf32>
      %124 = tpu.matmul %118, %123, %cst_61 {dimension_numbers = #tpu.dot_dimension_numbers<[1], [0], [0], [1], [0, 0, 1, 1], [], []>} : vector<128x32xbf16>, vector<32x64xbf16>, vector<128x64xf32> -> vector<128x64xf32>
      %125 = arith.truncf %124 : vector<128x64xf32> to vector<128x64xbf16>
      %c0_62 = arith.constant 0 : index
      %c0_63 = arith.constant 0 : index
      %126 = vector.load %arg15[%c0_62, %c0_63] : memref<128x64xbf16, #tpu.memory_space<vmem>>, vector<128x64xbf16>
      tpu.vector_store %arg15[%c0_62, %c0_63], %125 {strides = array<i32>} : memref<128x64xbf16, #tpu.memory_space<vmem>>, vector<128x64xbf16>,
    } else {
    }
    %c0 = arith.constant 0 : index
    %c0_1 = arith.constant 0 : index
    %c0_2 = arith.constant 0 : index
    %3 = vector.load %arg2[%c0, %c0_1, %c0_2] : memref<1x16x64xf32, #tpu.memory_space<vmem>>, vector<1x16x64xf32>
    %4 = vector.shape_cast %3 : vector<1x16x64xf32> to vector<16x64xf32>
    %c0_3 = arith.constant 0 : index
    %c0_4 = arith.constant 0 : index
    %5 = vector.load %arg6[%c0_3, %c0_4] : memref<1x64xf32, #tpu.memory_space<vmem>>, vector<1x64xf32>
    %c0_5 = arith.constant 0 : index
    %c0_6 = arith.constant 0 : index
    %6 = vector.load %arg7[%c0_5, %c0_6] : memref<1x64xf32, #tpu.memory_space<vmem>>, vector<1x64xf32>
    %cst = arith.constant dense<0.000000e+00> : vector<16xf32>
    %7 = vector.multi_reduction <add>, %4, %cst [1] : vector<16x64xf32> to vector<16xf32>
    %8 = vector.shape_cast %7 : vector<16xf32> to vector<16x1xf32>
    %cst_7 = arith.constant 6.400000e+01 : f32
    %9 = vector.broadcast %cst_7 : f32 to vector<16x1xf32>
    %10 = arith.divf %8, %9 : vector<16x1xf32>
    %11 = arith.mulf %4, %4 : vector<16x64xf32>
    %cst_8 = arith.constant dense<0.000000e+00> : vector<16xf32>
    %12 = vector.multi_reduction <add>, %11, %cst_8 [1] : vector<16x64xf32> to vector<16xf32>
    %13 = vector.shape_cast %12 : vector<16xf32> to vector<16x1xf32>
    %cst_9 = arith.constant 6.400000e+01 : f32
    %14 = vector.broadcast %cst_9 : f32 to vector<16x1xf32>
    %15 = arith.divf %13, %14 : vector<16x1xf32>
    %16 = arith.mulf %10, %10 : vector<16x1xf32>
    %17 = arith.subf %15, %16 : vector<16x1xf32>
    %18 = vector.broadcast %10 : vector<16x1xf32> to vector<16x64xf32>
    %19 = arith.subf %4, %18 : vector<16x64xf32>
    %cst_10 = arith.constant 9.99999974E-6 : f32
    %20 = vector.broadcast %cst_10 : f32 to vector<16x1xf32>
    %21 = arith.addf %17, %20 : vector<16x1xf32>
    %22 = math.rsqrt %21 : vector<16x1xf32>
    %23 = vector.broadcast %22 : vector<16x1xf32> to vector<16x64xf32>
    %24 = arith.mulf %19, %23 : vector<16x64xf32>
    %25 = vector.broadcast %5 : vector<1x64xf32> to vector<16x64xf32>
    %26 = arith.mulf %24, %25 : vector<16x64xf32>
    %27 = vector.broadcast %6 : vector<1x64xf32> to vector<16x64xf32>
    %28 = arith.addf %26, %27 : vector<16x64xf32>
    %29 = arith.truncf %28 : vector<16x64xf32> to vector<16x64xbf16>
    %c0_11 = arith.constant 0 : index
    %c0_12 = arith.constant 0 : index
    %30 = vector.load %arg8[%c0_11, %c0_12] : memref<64x64xbf16, #tpu.memory_space<vmem>>, vector<64x64xbf16>
    %cst_13 = arith.constant dense<0.000000e+00> : vector<16x64xf32>
    %31 = tpu.matmul %29, %30, %cst_13 {dimension_numbers = #tpu.dot_dimension_numbers<[1], [0], [0], [1], [0, 0, 1, 1], [], []>} : vector<16x64xbf16>, vector<64x64xbf16>, vector<16x64xf32> -> vector<16x64xf32>
    %cst_14 = arith.constant 0.176776692 : f32
    %32 = vector.broadcast %cst_14 : f32 to vector<16x64xf32>
    %33 = arith.mulf %31, %32 : vector<16x64xf32>
    %34 = arith.truncf %33 : vector<16x64xf32> to vector<16x64xbf16>
    %c0_15 = arith.constant 0 : index
    %c0_16 = arith.constant 0 : index
    %35 = vector.load %arg14[%c0_15, %c0_16] : memref<128x64xbf16, #tpu.memory_space<vmem>>, vector<128x64xbf16>
    %c0_17 = arith.constant 0 : index
    %c0_18 = arith.constant 0 : index
    %36 = vector.load %arg15[%c0_17, %c0_18] : memref<128x64xbf16, #tpu.memory_space<vmem>>, vector<128x64xbf16>
    %37 = tpu.iota {dimensions = array<i32: 1>} : vector<1x128xi32>
    %c8_i32 = arith.constant 8 : i32
    %38 = vector.broadcast %c8_i32 : i32 to vector<1x128xi32>
    %39 = arith.cmpi slt, %37, %38 : vector<1x128xi32>
    %40 = vector.extract_strided_slice %34 {offsets = [0, 0], sizes = [16, 32], strides = [1, 1]} : vector<16x64xbf16> to vector<16x32xbf16>
    %41 = vector.extract_strided_slice %35 {offsets = [0, 0], sizes = [128, 32], strides = [1, 1]} : vector<128x64xbf16> to vector<128x32xbf16>
    %cst_19 = arith.constant dense<0.000000e+00> : vector<16x128xf32>
    %42 = tpu.matmul %40, %41, %cst_19 {dimension_numbers = #tpu.dot_dimension_numbers<[1], [1], [0], [0], [0, 0, 1, 0], [], []>} : vector<16x32xbf16>, vector<128x32xbf16>, vector<16x128xf32> -> vector<16x128xf32>
    %cst_20 = arith.constant -1.000000e+30 : f32
    %43 = vector.shape_cast %39 : vector<1x128xi1> to vector<1x128xi1>
    %44 = vector.broadcast %43 : vector<1x128xi1> to vector<16x128xi1>
    %45 = vector.broadcast %cst_20 : f32 to vector<16x128xf32>
    %46 = arith.select %44, %42, %45 : vector<16x128xi1>, vector<16x128xf32>
    %cst_21 = arith.constant dense<0xFF800000> : vector<16xf32>
    %47 = vector.multi_reduction <maximumf>, %46, %cst_21 [1] : vector<16x128xf32> to vector<16xf32>
    %48 = vector.shape_cast %47 : vector<16xf32> to vector<16x1xf32>
    %49 = vector.broadcast %48 : vector<16x1xf32> to vector<16x128xf32>
    %50 = arith.subf %46, %49 : vector<16x128xf32>
    %51 = math.exp %50 : vector<16x128xf32>
    %cst_22 = arith.constant dense<0.000000e+00> : vector<16xf32>
    %52 = vector.multi_reduction <add>, %51, %cst_22 [1] : vector<16x128xf32> to vector<16xf32>
    %53 = vector.shape_cast %52 : vector<16xf32> to vector<16x1xf32>
    %54 = tpu.reciprocal %53 {approx = true} : vector<16x1xf32> -> vector<16x1xf32>
    %55 = vector.broadcast %54 : vector<16x1xf32> to vector<16x128xf32>
    %56 = arith.mulf %51, %55 : vector<16x128xf32>
    %57 = arith.truncf %56 : vector<16x128xf32> to vector<16x128xbf16>
    %58 = vector.extract_strided_slice %36 {offsets = [0, 0], sizes = [128, 32], strides = [1, 1]} : vector<128x64xbf16> to vector<128x32xbf16>
    %cst_23 = arith.constant dense<0.000000e+00> : vector<16x32xf32>
    %59 = tpu.matmul %57, %58, %cst_23 {dimension_numbers = #tpu.dot_dimension_numbers<[1], [0], [0], [1], [0, 0, 1, 1], [], []>} : vector<16x128xbf16>, vector<128x32xbf16>, vector<16x32xf32> -> vector<16x32xf32>
    %c0_24 = arith.constant 0 : index
    %c0_25 = arith.constant 0 : index
    %60 = vector.load %arg16[%c0_24, %c0_25] : memref<16x64xf32, #tpu.memory_space<vmem>>, vector<16x32xf32>
    tpu.vector_store %arg16[%c0_24, %c0_25], %59 {strides = array<i32>} : memref<16x64xf32, #tpu.memory_space<vmem>>, vector<16x32xf32>,
    %61 = vector.extract_strided_slice %34 {offsets = [0, 32], sizes = [16, 32], strides = [1, 1]} : vector<16x64xbf16> to vector<16x32xbf16>
    %62 = vector.extract_strided_slice %35 {offsets = [0, 32], sizes = [128, 32], strides = [1, 1]} : vector<128x64xbf16> to vector<128x32xbf16>
    %cst_26 = arith.constant dense<0.000000e+00> : vector<16x128xf32>
    %63 = tpu.matmul %61, %62, %cst_26 {dimension_numbers = #tpu.dot_dimension_numbers<[1], [1], [0], [0], [0, 0, 1, 0], [], []>} : vector<16x32xbf16>, vector<128x32xbf16>, vector<16x128xf32> -> vector<16x128xf32>
    %cst_27 = arith.constant -1.000000e+30 : f32
    %64 = vector.shape_cast %39 : vector<1x128xi1> to vector<1x128xi1>
    %65 = vector.broadcast %64 : vector<1x128xi1> to vector<16x128xi1>
    %66 = vector.broadcast %cst_27 : f32 to vector<16x128xf32>
    %67 = arith.select %65, %63, %66 : vector<16x128xi1>, vector<16x128xf32>
    %cst_28 = arith.constant dense<0xFF800000> : vector<16xf32>
    %68 = vector.multi_reduction <maximumf>, %67, %cst_28 [1] : vector<16x128xf32> to vector<16xf32>
    %69 = vector.shape_cast %68 : vector<16xf32> to vector<16x1xf32>
    %70 = vector.broadcast %69 : vector<16x1xf32> to vector<16x128xf32>
    %71 = arith.subf %67, %70 : vector<16x128xf32>
    %72 = math.exp %71 : vector<16x128xf32>
    %cst_29 = arith.constant dense<0.000000e+00> : vector<16xf32>
    %73 = vector.multi_reduction <add>, %72, %cst_29 [1] : vector<16x128xf32> to vector<16xf32>
    %74 = vector.shape_cast %73 : vector<16xf32> to vector<16x1xf32>
    %75 = tpu.reciprocal %74 {approx = true} : vector<16x1xf32> -> vector<16x1xf32>
    %76 = vector.broadcast %75 : vector<16x1xf32> to vector<16x128xf32>
    %77 = arith.mulf %72, %76 : vector<16x128xf32>
    %78 = arith.truncf %77 : vector<16x128xf32> to vector<16x128xbf16>
    %79 = vector.extract_strided_slice %36 {offsets = [0, 32], sizes = [128, 32], strides = [1, 1]} : vector<128x64xbf16> to vector<128x32xbf16>
    %cst_30 = arith.constant dense<0.000000e+00> : vector<16x32xf32>
    %80 = tpu.matmul %78, %79, %cst_30 {dimension_numbers = #tpu.dot_dimension_numbers<[1], [0], [0], [1], [0, 0, 1, 1], [], []>} : vector<16x128xbf16>, vector<128x32xbf16>, vector<16x32xf32> -> vector<16x32xf32>
    %c0_31 = arith.constant 0 : index
    %c32 = arith.constant 32 : index
    %81 = vector.load %arg16[%c0_31, %c32] : memref<16x64xf32, #tpu.memory_space<vmem>>, vector<16x32xf32>
    tpu.vector_store %arg16[%c0_31, %c32], %80 {strides = array<i32>} : memref<16x64xf32, #tpu.memory_space<vmem>>, vector<16x32xf32>,
    %c0_32 = arith.constant 0 : index
    %c0_33 = arith.constant 0 : index
    %82 = vector.load %arg16[%c0_32, %c0_33] : memref<16x64xf32, #tpu.memory_space<vmem>>, vector<16x64xf32>
    %83 = arith.truncf %82 : vector<16x64xf32> to vector<16x64xbf16>
    %c0_34 = arith.constant 0 : index
    %c0_35 = arith.constant 0 : index
    %84 = vector.load %arg11[%c0_34, %c0_35] : memref<64x64xbf16, #tpu.memory_space<vmem>>, vector<64x64xbf16>
    %cst_36 = arith.constant dense<0.000000e+00> : vector<16x64xf32>
    %85 = tpu.matmul %83, %84, %cst_36 {dimension_numbers = #tpu.dot_dimension_numbers<[1], [0], [0], [1], [0, 0, 1, 1], [], []>} : vector<16x64xbf16>, vector<64x64xbf16>, vector<16x64xf32> -> vector<16x64xf32>
    %c0_37 = arith.constant 0 : index
    %c0_38 = arith.constant 0 : index
    %86 = vector.load %arg12[%c0_37, %c0_38] : memref<1x64xf32, #tpu.memory_space<vmem>>, vector<1x64xf32>
    %87 = vector.broadcast %86 : vector<1x64xf32> to vector<16x64xf32>
    %88 = arith.addf %85, %87 : vector<16x64xf32>
    %c0_39 = arith.constant 0 : index
    %c0_40 = arith.constant 0 : index
    %c0_41 = arith.constant 0 : index
    %89 = vector.load %arg13[%c0_39, %c0_40, %c0_41] : memref<1x16x64xf32, #tpu.memory_space<vmem>>, vector<1x16x64xf32>
    %90 = vector.shape_cast %89 : vector<1x16x64xf32> to vector<16x64xf32>
    %91 = vector.shape_cast %88 : vector<16x64xf32> to vector<1x16x64xf32>
    tpu.vector_store %arg13[%c0_39, %c0_40, %c0_41], %91 {strides = array<i32>} : memref<1x16x64xf32, #tpu.memory_space<vmem>>, vector<1x16x64xf32>,
    return
  }
  func.func @transform_0(%arg0: i32, %arg1: i32) -> (i32, i32, i32) {
    %c0_i32 = arith.constant 0 : i32
    %c0_i32_0 = arith.constant 0 : i32
    return %arg0, %arg1, %c0_i32 : i32, i32, i32
  }
  func.func @transform_1(%arg0: i32, %arg1: i32) -> (i32, i32, i32) {
    %c0_i32 = arith.constant 0 : i32
    %c0_i32_0 = arith.constant 0 : i32
    %c0_i32_1 = arith.constant 0 : i32
    return %arg0, %c0_i32, %c0_i32_0 : i32, i32, i32
  }
  func.func @transform_2(%arg0: i32, %arg1: i32) -> (i32, i32) {
    %c0_i32 = arith.constant 0 : i32
    %c0_i32_0 = arith.constant 0 : i32
    %c0_i32_1 = arith.constant 0 : i32
    return %c0_i32, %c0_i32_0 : i32, i32
  }
  func.func @transform_3(%arg0: i32, %arg1: i32) -> (i32, i32) {
    %c0_i32 = arith.constant 0 : i32
    %c0_i32_0 = arith.constant 0 : i32
    %c0_i32_1 = arith.constant 0 : i32
    return %c0_i32, %c0_i32_0 : i32, i32
  }
  func.func @transform_4(%arg0: i32, %arg1: i32) -> (i32, i32) {
    %c0_i32 = arith.constant 0 : i32
    %c0_i32_0 = arith.constant 0 : i32
    %c0_i32_1 = arith.constant 0 : i32
    return %c0_i32, %c0_i32_0 : i32, i32
  }
  func.func @transform_5(%arg0: i32, %arg1: i32) -> (i32, i32) {
    %c0_i32 = arith.constant 0 : i32
    %c0_i32_0 = arith.constant 0 : i32
    %c0_i32_1 = arith.constant 0 : i32
    return %c0_i32, %c0_i32_0 : i32, i32
  }
  func.func @transform_6(%arg0: i32, %arg1: i32) -> (i32, i32) {
    %c0_i32 = arith.constant 0 : i32
    %c0_i32_0 = arith.constant 0 : i32
    %c0_i32_1 = arith.constant 0 : i32
    return %c0_i32, %c0_i32_0 : i32, i32
  }
  func.func @transform_7(%arg0: i32, %arg1: i32) -> (i32, i32) {
    %c0_i32 = arith.constant 0 : i32
    %c0_i32_0 = arith.constant 0 : i32
    %c0_i32_1 = arith.constant 0 : i32
    return %c0_i32, %c0_i32_0 : i32, i32
  }
  func.func @transform_8(%arg0: i32, %arg1: i32) -> (i32, i32) {
    %c0_i32 = arith.constant 0 : i32
    %c0_i32_0 = arith.constant 0 : i32
    %c0_i32_1 = arith.constant 0 : i32
    return %c0_i32, %c0_i32_0 : i32, i32
  }
  func.func @transform_9(%arg0: i32, %arg1: i32) -> (i32, i32) {
    %c0_i32 = arith.constant 0 : i32
    %c0_i32_0 = arith.constant 0 : i32
    %c0_i32_1 = arith.constant 0 : i32
    return %c0_i32, %c0_i32_0 : i32, i32
  }
  func.func @transform_10(%arg0: i32, %arg1: i32) -> (i32, i32) {
    %c0_i32 = arith.constant 0 : i32
    %c0_i32_0 = arith.constant 0 : i32
    %c0_i32_1 = arith.constant 0 : i32
    return %c0_i32, %c0_i32_0 : i32, i32
  }
  func.func @transform_11(%arg0: i32, %arg1: i32) -> (i32, i32, i32) {
    %c0_i32 = arith.constant 0 : i32
    %c0_i32_0 = arith.constant 0 : i32
    return %arg0, %arg1, %c0_i32 : i32, i32, i32
  }
}

</mosaic_0001>

<bundles_post_ra>
// kernel: tpu_custom_call.1
= control target key start
LH: loop header
LB: loop body
LE: loop exit
PB: predicated region body
PF: predicated region fallthrough
CT: control target
= control target key end

     0   :  { %s2927_s0 = inlined_call_operand.vmem [shape: f32[2,16,64], index: 0, kind: input, shape index: {}]   ;;  %s2928_s1 = inlined_call_operand.vmem [shape: f32[2,128,32], index: 1, kind: input, shape index: {}]   ;;  %s2929_s2 = inlined_call_operand.vmem [shape: f32[1,32], index: 2, kind: input, shape index: {}]   ;;  %s2930_s3 = inlined_call_operand.vmem [shape: f32[1,32], index: 3, kind: input, shape index: {}]   ;;  %s2931_s4 = inlined_call_operand.vmem [shape: f32[1,64], index: 4, kind: input, shape index: {}]   ;;  %s2932_s5 = inlined_call_operand.vmem [shape: f32[1,64], index: 5, kind: input, shape index: {}]   ;;  %s2933_s6 = inlined_call_operand.vmem [shape: bf16[64,64], index: 6, kind: input, shape index: {}]   ;;  %s2934_s7 = inlined_call_operand.vmem [shape: bf16[32,64], index: 7, kind: input, shape index: {}]   ;;  %s2935_s8 = inlined_call_operand.vmem [shape: bf16[32,64], index: 8, kind: input, shape index: {}]   ;;  %s2936_s9 = inlined_call_operand.vmem [shape: bf16[64,64], index: 9, kind: input, shape index: {}]   ;;  %s2937_s10 = inlined_call_operand.vmem [shape: f32[1,64], index: 10, kind: input, shape index: {}]   ;;  %s2938_s11 = inlined_call_operand.hbm [shape: f32[2,16,64], index: 11, kind: output, shape index: {}]  }
   0x1   :  { %2939 = sst [smem:[#allocation8_spill]] %s2927_s0 }
   0x2   :  { %2940 = sst [smem:[#allocation9_spill]] %s2928_s1 }
   0x3   :  { %16 = vsyncpa [#allocation6], 0 }
   0x4   :  { %18 = vsyncpa [#allocation6 + $0x1], 0  ;;  %s2258_s17 = smov 0   ;;  %s2260_s18 = smov 0  }
   0x5   :  { %s2262_s19 = smov 0   ;;  %s2264_s20 = smov 0  }
   0x6   :  { %s2266_s21 = smov 0   ;;  %s2268_s22 = smov 0  }
   0x7 LB: > { %s1717_s23 = sadd.s32 4294967295, %s2189_s22   ;;  %s1718_s24 = sadd.s32 4294967294, %s2189_s22   ;;  %s2189_s22 = sphi %s2268_s22, %s24_s22   ;;  %s2185_s21 = sphi %s2266_s21, %s2949_s21   ;;  %s2181_s20 = sphi %s2264_s20, %s2948_s20   ;;  %s2177_s19 = sphi %s2262_s19, %s2947_s19   ;;  %s2173_s18 = sphi %s2260_s18, %s2946_s18   ;;  %s2169_s17 = sphi %s2258_s17, %s2945_s17  }
   0x8   : > { %s36_s25 = sadd.s32 1, %s2185_s21  ;;  %s288_s26 = sadd.s32 1, %s2177_s19 }
   0x9   : > { %p38_p0 = scmp.ge.s32.totalorder %s36_s25, 2  ;;  %p298_p1 = scmp.ne.s32.totalorder %s2177_s19, %s2173_s18 }
   0xa   : > { %p299_p2 = scmp.eq.s32.totalorder %s1717_s23, 1  ;;  %p304_p3 = scmp.ne.s32.totalorder %s2173_s18, %s2169_s17 }
   0xb   : > { %s2951_s25 = smov (%p38_p0, %s36_s25), 0  ;;  %p305_p5 = scmp.eq.s32.totalorder %s1718_s24, 1 }
   0xc   : > { %p2298_p4 = por %p299_p2, %p298_p1  ;;  %s283_s28 = ssub.s32 %s2185_s21, %s2951_s25 }
   0xd   : > { %p1721_p6 = scmp.ge.s32.totalorder %s2189_s22, 1  ;;  %p286_p7 = scmp.eq.s32.totalorder %s283_s28, 0 }
   0xe   : > { %p2305_p8 = por %p305_p5, %p304_p3  ;;  %p371_p9 = scmp.lt.s32.totalorder %s2189_s22, 3 }
   0xf   : > { %s2311_s30 = scalar_select %p286_p7, %s2177_s19, %s288_s26  }
  0x10   : > { %p372_p10 = pnand %p1721_p6, %p371_p9 }
  0x11   : > { %p421_p11 = scmp.lt.s32.totalorder (!%p372_p10), %s2181_s20, 1  ;;  %vm459_vm0 = vcmask (!%p372_p10), 261120   ;;  %s2943_s1 = sld [smem:[#allocation9_spill]] (!%p372_p10)  ;;  %v2047_v50 = vld [vmem:[%s2934_s7] sm:$0xff] (!%p372_p10)   ;;  %v2048_v55 = vld [vmem:[%s2934_s7 + $0x8] sm:$0xff] (!%p372_p10)   ;;  %vm898_vm1 = vcmask (!%p372_p10), 523264  }
  0x12   : > { %375 = sbr.rel (%p372_p10) target bundleno = 2195 (0x893), region = 64  ;;  %1838 = vmatprep.subr.bf16.mxu0 (!%p372_p10), %v2047_v50  ;;  %1982 = vmatprep.subr.bf16.mxu1 (!%p372_p10), %v2047_v50  ;;  %s2944_s0 = sld [smem:[#allocation8_spill]] (!%p372_p10)  ;;  %vm2192_vm2 = vmmov (!%p372_p10), 0   ;;  %vm1519_vm4 = vcmask (!%p372_p10), 523520  }
  0x13   : > { %1839 = vmatpush3.bf16.msra.mxu0 (!%p372_p10), %v2047_v50  ;;  %1984 = vmatpush3.bf16.msra.mxu1 (!%p372_p10), %v2047_v50  ;;  %s2193_s24 = smov (!%p372_p10), 96   ;;  %s417_s26 = sand.u32 (!%p372_p10), 1, %s2173_s18  }
  0x14   : > { %1840 = vmatprep.subr.bf16.mxu0 (!%p372_p10), %v2048_v55  ;;  %1983 = vmatprep.subr.bf16.mxu1 (!%p372_p10), %v2048_v55  ;;  %s1722_s28 = sshll.u32 (!%p372_p10), %s417_s26, 4 }
  0x15   : > { %s419_s15 = scalar_lea.vmem (!%p372_p10), [#allocation5], %s1722_s28 }
  0x17   : > { %1841 = vmatpush3.bf16.msra.mxu0 (!%p372_p10), %v2048_v55  ;;  %1985 = vmatpush3.bf16.msra.mxu1 (!%p372_p10), %v2048_v55 }
  0x19   : > { %s2315_s12 = scalar_select %p421_p11, %s2181_s20, 1 }
  0x1b   : > { %s1770_s13 = sshll.u32 %s2315_s12, 7 }
  0x1c   : > { %s2321_s16 = scalar_lea.vmem %s2943_s1, %s1770_s13  ;;  %s1769_s13 = sshll.u32 %s2315_s12, 4 }
  0x1d   : > { %v2324_v0 = vld [vmem:[%s2321_s16 + $0x10] sm:$0xff]  ;;  %v2327_v1 = vld [vmem:[%s2321_s16] sm:$0xff]  ;;  %v2330_v2 = vld [vmem:[%s2321_s16 + $0x18] sm:$0xff]  ;;  %s1771_s12 = sshll.u32 %s2181_s20, 8  ;;  %s2881_s20 = scalar_lea.sflag [#allocation6], %s417_s26 }
  0x1e   : > { %v466_v3 = vsel %vm459_vm0, %v2324_v0, 0.0  ;;  %v460_v4 = vsel %vm459_vm0, %v2327_v1, 0.0  ;;  %v2337_v5 = vld [vmem:[%s2321_s16 + $0x8] sm:$0xff]  ;;  %v469_v6 = vsel %vm459_vm0, %v2330_v2, 0.0  ;;  %v525_v9 = vmul.f32 %v2327_v1, %v2327_v1  ;;  %v2359_v17 = vld [vmem:[%s2321_s16 + $0x20] sm:$0xff]  ;;  %v2366_v20 = vld [vmem:[%s2321_s16 + $0x38] sm:$0xff] }
  0x1f   : > { %467 = vadd.xlane.f32.xlu1 %v466_v3  ;;  %461 = vadd.xlane.f32.xlu0 %v460_v4  ;;  %v463_v7 = vsel %vm459_vm0, %v2337_v5, 0.0  ;;  %v526_v8 = vmul.f32 %v2337_v5, %v2337_v5  ;;  %v528_v10 = vmul.f32 %v2330_v2, %v2330_v2  ;;  %v527_v11 = vmul.f32 %v2324_v0, %v2324_v0  ;;  %v2356_v16 = vld [vmem:[%s2321_s16 + $0x28] sm:$0xff]  ;;  %v2369_v21 = vld [vmem:[%s2321_s16 + $0x30] sm:$0xff]  ;;  %v2391_v33 = vld [vmem:[%s2321_s16 + $0x40] sm:$0xff] }
  0x20   : > { %v541_v13 = vsel %vm459_vm0, %v525_v9, 0.0  ;;  %v475_v18 = vsel %vm459_vm0, %v2356_v16, 0.0  ;;  %v472_v19 = vsel %vm459_vm0, %v2359_v17, 0.0  ;;  %v481_v22 = vsel %vm459_vm0, %v2366_v20, 0.0  ;;  %v2388_v32 = vld [vmem:[%s2321_s16 + $0x48] sm:$0xff]  ;;  %v2398_v36 = vld [vmem:[%s2321_s16 + $0x58] sm:$0xff] }
  0x21   : > { %v544_v12 = vsel %vm459_vm0, %v526_v8, 0.0  ;;  %v550_v14 = vsel %vm459_vm0, %v528_v10, 0.0  ;;  %v547_v15 = vsel %vm459_vm0, %v527_v11, 0.0  ;;  %v478_v23 = vsel %vm459_vm0, %v2369_v21, 0.0  ;;  %v2401_v37 = vld [vmem:[%s2321_s16 + $0x50] sm:$0xff]  ;;  %v2420_v48 = vld [vmem:[%s2321_s16 + $0x68] sm:$0xff] }
  0x22   : > { %v530_v24 = vmul.f32 %v2356_v16, %v2356_v16  ;;  %v529_v25 = vmul.f32 %v2359_v17, %v2359_v17  ;;  %v532_v28 = vmul.f32 %v2366_v20, %v2366_v20  ;;  %v531_v29 = vmul.f32 %v2369_v21, %v2369_v21  ;;  %v2423_v49 = vld [vmem:[%s2321_s16 + $0x60] sm:$0xff]  ;;  %v2433_v53 = vld [vmem:[%s2321_s16 + $0x78] sm:$0xff]  ;;  %v2436_v54 = vld [vmem:[%s2321_s16 + $0x70] sm:$0xff]  ;;  %s428_s16 = scalar_lea.vmem %s2944_s0, %s1769_s13  ;;  %s2877_s0 = scalar_lea.hbm %s2938_s11, %s1771_s12 }
  0x23   : > { %470 = vadd.xlane.f32.xlu1 %v469_v6  ;;  %464 = vadd.xlane.f32.xlu0 %v463_v7  ;;  %v487_v34 = vsel %vm459_vm0, %v2388_v32, 0.0  ;;  %v484_v35 = vsel %vm459_vm0, %v2391_v33, 0.0  ;;  %v493_v38 = vsel %vm459_vm0, %v2398_v36, 0.0  ;;  %v490_v39 = vsel %vm459_vm0, %v2401_v37, 0.0  ;;  %v2461_v6 = vld [vmem:[%s428_s16 + $0x8] sm:$0xff]  ;;  %v2463_v7 = vld [vmem:[%s428_s16] sm:$0xff] }
  0x24   : > { %v556_v26 = vsel %vm459_vm0, %v530_v24, 0.0  ;;  %v553_v27 = vsel %vm459_vm0, %v529_v25, 0.0  ;;  %v562_v30 = vsel %vm459_vm0, %v532_v28, 0.0  ;;  %v559_v31 = vsel %vm459_vm0, %v531_v29, 0.0  ;;  %s1626_s16 = sshll.u32 %s419_s15, 4  ;;  %s2195_s13 = smov [#allocation5]   ;;  %s2872_s16 = int_to_ptr.vmem [resolvable:$true] %s1626_s16 }
  0x25   : > { %v534_v40 = vmul.f32 %v2388_v32, %v2388_v32  ;;  %v533_v41 = vmul.f32 %v2391_v33, %v2391_v33  ;;  %v536_v44 = vmul.f32 %v2398_v36, %v2398_v36  ;;  %v535_v45 = vmul.f32 %v2401_v37, %v2401_v37  ;;  %s2111_s28 = scalar_lea.vmem %s2872_s16, 256  ;;  %s2115_s14 = sshll.u32 %s2195_s13, 4  ;;  %s2116_s14 = int_to_ptr.vmem [resolvable:$false] %s2115_s14 }
  0x26   : > { %v499_v51 = vsel %vm459_vm0, %v2420_v48, 0.0  ;;  %v496_v52 = vsel %vm459_vm0, %v2423_v49, 0.0  ;;  %v505_v56 = vsel %vm459_vm0, %v2433_v53, 0.0  ;;  %v502_v57 = vsel %vm459_vm0, %v2436_v54, 0.0  ;;  %p2112_p12 = scmp.ne.s32.totalorder %s2872_s16, %s2111_s28  ;;  %s2117_s1 = scalar_lea.vmem %s2116_s14, 512 }
  0x27   : > { %545 = vadd.xlane.f32.xlu1 %v544_v12  ;;  %542 = vadd.xlane.f32.xlu0 %v541_v13  ;;  %v568_v42 = vsel %vm459_vm0, %v534_v40, 0.0  ;;  %v565_v43 = vsel %vm459_vm0, %v533_v41, 0.0  ;;  %v574_v46 = vsel %vm459_vm0, %v536_v44, 0.0  ;;  %v571_v47 = vsel %vm459_vm0, %v535_v45, 0.0  ;;  %p2118_p1 = scmp.lt.s32.totalorder %s2872_s16, %s2116_s14  ;;  %p2119_p2 = scmp.lt.s32.totalorder %s2117_s1, %s2111_s28 }
  0x28   : > { %v538_v58 = vmul.f32 %v2420_v48, %v2420_v48  ;;  %v537_v59 = vmul.f32 %v2423_v49, %v2423_v49  ;;  %v540_v62 = vmul.f32 %v2433_v53, %v2433_v53  ;;  %v539_v63 = vmul.f32 %v2436_v54, %v2436_v54  ;;  %p2113_p13 = pnand %p2112_p12, %p2298_p4 }
  0x29   : > { %v1044_v8 = vsel %vm898_vm1, %v2461_v6, 0.0  ;;  %v1041_v9 = vsel %vm898_vm1, %v2463_v7, 0.0  ;;  %v1051_v10 = vmul.f32 %v2461_v6, %v2461_v6  ;;  %v1050_v11 = vmul.f32 %v2463_v7, %v2463_v7  ;;  %p2120_p3 = por %p2119_p2, %p2118_p1 }
  0x2a   : > { %v580_v60 = vsel %vm459_vm0, %v538_v58, 0.0  ;;  %v577_v61 = vsel %vm459_vm0, %v537_v59, 0.0  ;;  %v586_v3 = vsel %vm459_vm0, %v540_v62, 0.0  ;;  %v583_v4 = vsel %vm459_vm0, %v539_v63, 0.0  ;;  %p2114_p0 = pneg %p2113_p13 }
  0x2b   : > { %551 = vadd.xlane.f32.xlu1 %v550_v14  ;;  %548 = vadd.xlane.f32.xlu0 %v547_v15  ;;  %v1055_v12 = vsel %vm898_vm1, %v1051_v10, 0.0  ;;  %v1052_v13 = vsel %vm898_vm1, %v1050_v11, 0.0  ;;  %v2191_v14 = vmov 0.0   ;;  %v2479_v15 = vld [vmem:[%s2935_s8] sm:$0xff]  }
  0x2c   : > { %1878 = vmatprep.subr.bf16.mxu0 %v2191_v14  ;;  %1858 = vmatprep.subr.bf16.mxu1 %v2479_v15  ;;  %p2121_p5 = pnand %p2120_p3, %p2114_p0 }
  0x2f   : > { %476 = vadd.xlane.f32.xlu1 %v475_v18  ;;  %473 = vadd.xlane.f32.xlu0 %v472_v19 }
  0x33   : > { %482 = vadd.xlane.f32.xlu1 %v481_v22  ;;  %479 = vadd.xlane.f32.xlu0 %v478_v23 }
  0x37   : > { %557 = vadd.xlane.f32.xlu1 %v556_v26  ;;  %554 = vadd.xlane.f32.xlu0 %v553_v27 }
  0x3b   : > { %563 = vadd.xlane.f32.xlu1 %v562_v30  ;;  %560 = vadd.xlane.f32.xlu0 %v559_v31 }
  0x3f   : > { %488 = vadd.xlane.f32.xlu1 %v487_v34  ;;  %485 = vadd.xlane.f32.xlu0 %v484_v35 }
  0x43   : > { %494 = vadd.xlane.f32.xlu1 %v493_v38  ;;  %491 = vadd.xlane.f32.xlu0 %v490_v39 }
  0x47   : > { %569 = vadd.xlane.f32.xlu1 %v568_v42  ;;  %566 = vadd.xlane.f32.xlu0 %v565_v43 }
  0x4b   : > { %575 = vadd.xlane.f32.xlu1 %v574_v46  ;;  %572 = vadd.xlane.f32.xlu0 %v571_v47 }
  0x4f   : > { %500 = vadd.xlane.f32.xlu1 %v499_v51  ;;  %497 = vadd.xlane.f32.xlu0 %v496_v52 }
  0x53   : > { %506 = vadd.xlane.f32.xlu1 %v505_v56  ;;  %503 = vadd.xlane.f32.xlu0 %v502_v57 }
  0x57   : > { %581 = vadd.xlane.f32.xlu1 %v580_v60  ;;  %578 = vadd.xlane.f32.xlu0 %v577_v61 }
  0x5b   : > { %587 = vadd.xlane.f32.xlu1 %v586_v3  ;;  %584 = vadd.xlane.f32.xlu0 %v583_v4 }
  0x5f   : > { %1045 = vadd.xlane.f32.xlu1 %v1044_v8  ;;  %1042 = vadd.xlane.f32.xlu0 %v1041_v9 }
  0x63   : > { %1056 = vadd.xlane.f32.xlu1 %v1055_v12  ;;  %1053 = vadd.xlane.f32.xlu0 %v1052_v13 }
  0xac   : > { %v468_v18 = vpop.xlane.xlu1 %467  ;;  %v462_v19 = vpop.xlane.xlu0 %461 }
  0xad   : > { %v509_v24 = vmul.f32 0.03125, %v462_v19  ;;  %v2482_v26 = vmul.f32 0.03125, %v468_v18 }
  0xaf   : > { %v605_v30 = vmul.f32 %v509_v24, %v509_v24  ;;  %v607_v40 = vmul.f32 %v2482_v26, %v2482_v26  ;;  %v637_v62 = vsub.f32 %v2327_v1, %v509_v24  ;;  %v2507_v1 = vld [vmem:[%s2929_s2] ss:$0 sm:$0xff] }
  0xb0   : > { %v471_v22 = vpop.xlane.xlu1 %470  ;;  %v465_v23 = vpop.xlane.xlu0 %464 }
  0xb1   : > { %v510_v25 = vmul.f32 0.03125, %v465_v23  ;;  %v2484_v27 = vmul.f32 0.03125, %v471_v22  ;;  %v639_v22 = vsub.f32 %v2324_v0, %v2482_v26 }
  0xb3   : > { %v606_v31 = vmul.f32 %v510_v25, %v510_v25  ;;  %v608_v41 = vmul.f32 %v2484_v27, %v2484_v27  ;;  %v638_v63 = vsub.f32 %v2337_v5, %v510_v25  ;;  %v2514_v25 = vld [vmem:[%s2930_s3] ss:$0 sm:$0xff] }
  0xb4   : > { %v546_v28 = vpop.xlane.xlu1 %545  ;;  %v543_v29 = vpop.xlane.xlu0 %542 }
  0xb5   : > { %v590_v34 = vmul.f32 0.03125, %v546_v28  ;;  %v589_v35 = vmul.f32 0.03125, %v543_v29  ;;  %v640_v29 = vsub.f32 %v2330_v2, %v2484_v27 }
  0xb7   : > { %v622_v38 = vsub.f32 %v590_v34, %v606_v31  ;;  %v621_v39 = vsub.f32 %v589_v35, %v605_v30 }
  0xb8   : > { %v552_v42 = vpop.xlane.xlu1 %551  ;;  %v549_v43 = vpop.xlane.xlu0 %548 }
  0xb9   : > { %v654_v44 = vadd.f32 1e-05, %v622_v38  ;;  %v653_v45 = vadd.f32 1e-05, %v621_v39  ;;  %v592_v46 = vmul.f32 0.03125, %v552_v42  ;;  %v591_v47 = vmul.f32 0.03125, %v549_v43 }
  0xbb   : > { %2059 = vrsqrt.f32 %v654_v44  ;;  %v624_v50 = vsub.f32 %v592_v46, %v608_v41  ;;  %v623_v51 = vsub.f32 %v591_v47, %v607_v40 }
  0xbc   : > { %2061 = vrsqrt.f32 %v653_v45  ;;  %v477_v52 = vpop.xlane.xlu1 %476  ;;  %v474_v55 = vpop.xlane.xlu0 %473 }
  0xbd   : > { %v656_v56 = vadd.f32 1e-05, %v624_v50  ;;  %v655_v57 = vadd.f32 1e-05, %v623_v51  ;;  %v2490_v60 = vmul.f32 0.03125, %v477_v52  ;;  %v2492_v61 = vmul.f32 0.03125, %v474_v55 }
  0xbf   : > { %2063 = vrsqrt.f32 %v656_v56  ;;  %v610_v11 = vmul.f32 %v2490_v60, %v2490_v60  ;;  %v609_v12 = vmul.f32 %v2492_v61, %v2492_v61 }
  0xc0   : > { %2065 = vrsqrt.f32 %v655_v57  ;;  %v483_v58 = vpop.xlane.xlu1 %482  ;;  %v480_v59 = vpop.xlane.xlu0 %479 }
  0xc1   : > { %v2496_v3 = vmul.f32 0.03125, %v483_v58  ;;  %v2498_v4 = vmul.f32 0.03125, %v480_v59 }
  0xc3   : > { %v612_v30 = vmul.f32 %v2496_v3, %v2496_v3  ;;  %v611_v31 = vmul.f32 %v2498_v4, %v2498_v4 }
  0xc4   : > { %v558_v8 = vpop.xlane.xlu1 %557  ;;  %v555_v9 = vpop.xlane.xlu0 %554 }
  0xc5   : > { %v2060_v10 = vpop.eup %2059  ;;  %v594_v13 = vmul.f32 0.03125, %v558_v8  ;;  %v593_v18 = vmul.f32 0.03125, %v555_v9 }
  0xc6   : > { %v2062_v5 = vpop.eup %2061  ;;  %v686_v19 = vmul.f32 %v2060_v10, %v638_v63 }
  0xc7   : > { %v626_v23 = vsub.f32 %v594_v13, %v610_v11  ;;  %v625_v24 = vsub.f32 %v593_v18, %v609_v12  ;;  %v685_v28 = vmul.f32 %v2062_v5, %v637_v62  ;;  %v2049_v11 = vld [vmem:[%s2933_s6] sm:$0xff]   ;;  %v642_v13 = vsub.f32 %v2356_v16, %v2490_v60 }
  0xc8   : > { %v564_v34 = vpop.xlane.xlu1 %563  ;;  %v561_v35 = vpop.xlane.xlu0 %560  ;;  %v708_v0 = vmul.f32 %v2507_v1, %v686_v19  ;;  %v641_v18 = vsub.f32 %v2359_v17, %v2492_v61  ;;  %v2050_v17 = vld [vmem:[%s2933_s6 + $0x8] sm:$0xff]  }
  0xc9   : > { %v2064_v26 = vpop.eup %2063  ;;  %v658_v38 = vadd.f32 1e-05, %v626_v23  ;;  %v657_v39 = vadd.f32 1e-05, %v625_v24  ;;  %v596_v40 = vmul.f32 0.03125, %v564_v34  ;;  %v595_v41 = vmul.f32 0.03125, %v561_v35 }
  0xca   : > { %v2066_v42 = vpop.eup %2065  ;;  %v707_v43 = vmul.f32 %v2507_v1, %v685_v28  ;;  %v730_v2 = vadd.f32 %v2514_v25, %v708_v0  ;;  %v688_v27 = vmul.f32 %v2064_v26, %v640_v29  ;;  %v643_v26 = vsub.f32 %v2369_v21, %v2498_v4 }
  0xcb   : > { %2067 = vrsqrt.f32 %v658_v38  ;;  %v628_v44 = vsub.f32 %v596_v40, %v612_v30  ;;  %v627_v45 = vsub.f32 %v595_v41, %v611_v31  ;;  %v687_v46 = vmul.f32 %v2066_v42, %v639_v22 }
  0xcc   : > { %2069 = vrsqrt.f32 %v657_v39  ;;  %v489_v47 = vpop.xlane.xlu1 %488  ;;  %v486_v50 = vpop.xlane.xlu0 %485  ;;  %v729_v51 = vadd.f32 %v2514_v25, %v707_v43  ;;  %v710_v52 = vmul.f32 %v2507_v1, %v688_v27  ;;  %v644_v31 = vsub.f32 %v2366_v20, %v2496_v3  ;;  %v2052_v20 = vld [vmem:[%s2933_s6 + $0x10] sm:$0xff]  }
  0xcd   : > { %v660_v55 = vadd.f32 1e-05, %v628_v44  ;;  %v659_v56 = vadd.f32 1e-05, %v627_v45  ;;  %v709_v58 = vmul.f32 %v2507_v1, %v687_v46  ;;  %v2534_v9 = vmul.f32 0.03125, %v489_v47 }
  0xce   : > { %v2527_v57 = vpack.c.bf16 %v730_v2, %v729_v51  ;;  %v732_v59 = vadd.f32 %v2514_v25, %v710_v52  ;;  %v2536_v10 = vmul.f32 0.03125, %v486_v50 }
  0xcf   : > { %2071 = vrsqrt.f32 %v660_v55  ;;  %v731_v8 = vadd.f32 %v2514_v25, %v709_v58  ;;  %v614_v28 = vmul.f32 %v2534_v9, %v2534_v9 }
  0xd0   : > { %2073 = vrsqrt.f32 %v659_v56  ;;  %1842 = vmatprep.mubr.msk.bf16.mxu0 %vm459_vm0, %v2527_v57  ;;  %v495_v62 = vpop.xlane.xlu1 %494  ;;  %v492_v63 = vpop.xlane.xlu0 %491  ;;  %v613_v29 = vmul.f32 %v2536_v10, %v2536_v10 }
  0xd1   : > { %v2541_v12 = vpack.c.bf16 %v732_v59, %v731_v8  ;;  %v2547_v5 = vmul.f32 0.03125, %v495_v62  ;;  %v2549_v19 = vmul.f32 0.03125, %v492_v63  ;;  %v2054_v63 = vld [vmem:[%s2933_s6 + $0x18] sm:$0xff]  }
  0xd3   : > { %1843 = vmatmul.mubr.msk.bf16.vlgmr.msra.gmra.mrb[0].mxu0 %vm459_vm0, %v2541_v12  ;;  %v616_v38 = vmul.f32 %v2547_v5, %v2547_v5  ;;  %v615_v39 = vmul.f32 %v2549_v19, %v2549_v19 }
  0xd4   : > { %v570_v22 = vpop.xlane.xlu1 %569  ;;  %v567_v23 = vpop.xlane.xlu0 %566  ;;  %1879 = vmatpush3.bf16.msra.mxu0 %v2049_v11 }
  0xd5   : > { %v2068_v24 = vpop.eup %2067  ;;  %v598_v16 = vmul.f32 0.03125, %v570_v22  ;;  %v597_v60 = vmul.f32 0.03125, %v567_v23  ;;  %1880 = vmatprep.subr.bf16.mxu0 %v2191_v14 }
  0xd6   : > { %v2070_v61 = vpop.eup %2069  ;;  %v690_v30 = vmul.f32 %v2068_v24, %v642_v13 }
  0xd7   : > { %v630_v34 = vsub.f32 %v598_v16, %v614_v28  ;;  %v629_v35 = vsub.f32 %v597_v60, %v613_v29  ;;  %v689_v0 = vmul.f32 %v2070_v61, %v641_v18  ;;  %v646_v16 = vsub.f32 %v2388_v32, %v2534_v9 }
  0xd8   : > { %v576_v40 = vpop.xlane.xlu1 %575  ;;  %v573_v41 = vpop.xlane.xlu0 %572  ;;  %v712_v42 = vmul.f32 %v2507_v1, %v690_v30  ;;  %1881 = vmatpush3.bf16.msra.mxu0 %v2050_v17  ;;  %v645_v60 = vsub.f32 %v2391_v33, %v2536_v10  ;;  %v648_v10 = vsub.f32 %v2398_v36, %v2547_v5 }
  0xd9   : > { %v2072_v3 = vpop.eup %2071  ;;  %v662_v43 = vadd.f32 1e-05, %v630_v34  ;;  %v661_v2 = vadd.f32 1e-05, %v629_v35  ;;  %v600_v27 = vmul.f32 0.03125, %v576_v40  ;;  %v599_v44 = vmul.f32 0.03125, %v573_v41  ;;  %1882 = vmatprep.subr.bf16.mxu0 %v2191_v14 }
  0xda   : > { %v2074_v21 = vpop.eup %2073  ;;  %v711_v4 = vmul.f32 %v2507_v1, %v689_v0  ;;  %v734_v45 = vadd.f32 %v2514_v25, %v712_v42  ;;  %v692_v46 = vmul.f32 %v2072_v3, %v644_v31  ;;  %v647_v41 = vsub.f32 %v2401_v37, %v2549_v19 }
  0xdb   : > { %2075 = vrsqrt.f32 %v662_v43  ;;  %v632_v47 = vsub.f32 %v600_v27, %v616_v38  ;;  %v631_v50 = vsub.f32 %v599_v44, %v615_v39  ;;  %v691_v51 = vmul.f32 %v2074_v21, %v643_v26 }
  0xdc   : > { %2077 = vrsqrt.f32 %v661_v2  ;;  %v501_v52 = vpop.xlane.xlu1 %500  ;;  %v498_v55 = vpop.xlane.xlu0 %497  ;;  %v733_v56 = vadd.f32 %v2514_v25, %v711_v4  ;;  %v714_v58 = vmul.f32 %v2507_v1, %v692_v46  ;;  %1883 = vmatpush3.bf16.msra.mxu0 %v2052_v20 }
  0xdd   : > { %v664_v59 = vadd.f32 1e-05, %v632_v47  ;;  %v663_v62 = vadd.f32 1e-05, %v631_v50  ;;  %v713_v11 = vmul.f32 %v2507_v1, %v691_v51  ;;  %1884 = vmatprep.subr.bf16.mxu0 %v2191_v14  ;;  %v2589_v24 = vmul.f32 0.03125, %v501_v52 }
  0xde   : > { %v2581_v8 = vpack.c.bf16 %v734_v45, %v733_v56  ;;  %v736_v13 = vadd.f32 %v2514_v25, %v714_v58  ;;  %v2591_v28 = vmul.f32 0.03125, %v498_v55 }
  0xdf   : > { %2079 = vrsqrt.f32 %v664_v59  ;;  %v735_v23 = vadd.f32 %v2514_v25, %v713_v11  ;;  %v618_v35 = vmul.f32 %v2589_v24, %v2589_v24 }
  0xe0   : > { %2081 = vrsqrt.f32 %v663_v62  ;;  %1846 = vmatprep.mubr.msk.bf16.mxu0 %vm459_vm0, %v2581_v8  ;;  %v507_v18 = vpop.xlane.xlu1 %506  ;;  %v504_v22 = vpop.xlane.xlu0 %503  ;;  %1885 = vmatpush3.bf16.msra.mxu0 %v2054_v63  ;;  %v617_v0 = vmul.f32 %v2591_v28, %v2591_v28 }
  0xe1   : > { %v2593_v29 = vpack.c.bf16 %v736_v13, %v735_v23  ;;  %1910 = vmatprep.subr.bf16.mxu0 %v2191_v14  ;;  %v2600_v17 = vmul.f32 0.03125, %v507_v18  ;;  %v2602_v61 = vmul.f32 0.03125, %v504_v22 }
  0xe3   : > { %1847 = vmatmul.mubr.msk.bf16.gmra.mrb[4].mxu0 %vm459_vm0, %v2593_v29  ;;  %v620_v42 = vmul.f32 %v2600_v17, %v2600_v17  ;;  %v619_v20 = vmul.f32 %v2602_v61, %v2602_v61 }
  0xe4   : > { %v582_v30 = vpop.xlane.xlu1 %581  ;;  %v579_v31 = vpop.xlane.xlu0 %578 }
  0xe5   : > { %v2076_v34 = vpop.eup %2075  ;;  %v602_v32 = vmul.f32 0.03125, %v582_v30  ;;  %v601_v9 = vmul.f32 0.03125, %v579_v31 }
  0xe6   : > { %v2078_v26 = vpop.eup %2077  ;;  %v694_v33 = vmul.f32 %v2076_v34, %v646_v16 }
  0xe7   : > { %v634_v38 = vsub.f32 %v602_v32, %v618_v35  ;;  %v633_v39 = vsub.f32 %v601_v9, %v617_v0  ;;  %v693_v40 = vmul.f32 %v2078_v26, %v645_v60  ;;  %v650_v9 = vsub.f32 %v2420_v48, %v2589_v24 }
  0xe8   : > { %v588_v3 = vpop.xlane.xlu1 %587  ;;  %v585_v43 = vpop.xlane.xlu0 %584  ;;  %v716_v2 = vmul.f32 %v2507_v1, %v694_v33  ;;  %v649_v33 = vsub.f32 %v2423_v49, %v2591_v28  ;;  %v651_v49 = vsub.f32 %v2436_v54, %v2602_v61 }
  0xe9   : > { %v2080_v27 = vpop.eup %2079  ;;  %v666_v44 = vadd.f32 1e-05, %v634_v38  ;;  %v665_v21 = vadd.f32 1e-05, %v633_v39  ;;  %v604_v36 = vmul.f32 0.03125, %v588_v3  ;;  %v603_v5 = vmul.f32 0.03125, %v585_v43 }
  0xea   : > { %v2082_v4 = vpop.eup %2081  ;;  %v715_v45 = vmul.f32 %v2507_v1, %v693_v40  ;;  %v738_v37 = vadd.f32 %v2514_v25, %v716_v2  ;;  %v696_v19 = vmul.f32 %v2080_v27, %v648_v10 }
  0xeb   : > { %2083 = vrsqrt.f32 %v666_v44  ;;  %v636_v46 = vsub.f32 %v604_v36, %v620_v42  ;;  %v635_v47 = vsub.f32 %v603_v5, %v619_v20  ;;  %v695_v50 = vmul.f32 %v2082_v4, %v647_v41  ;;  %v1749_v4 = vld [vmem:[%s2931_s4] ss:$0 sm:$0xff] }
  0xec   : > { %2085 = vrsqrt.f32 %v665_v21  ;;  %v1046_v51 = vpop.xlane.xlu1 %1045  ;;  %v1043_v52 = vpop.xlane.xlu0 %1042  ;;  %v737_v55 = vadd.f32 %v2514_v25, %v715_v45  ;;  %v718_v56 = vmul.f32 %v2507_v1, %v696_v19  ;;  %v652_v42 = vsub.f32 %v2433_v53, %v2600_v17 }
  0xed   : > { %v668_v58 = vadd.f32 1e-05, %v636_v46  ;;  %v667_v59 = vadd.f32 1e-05, %v635_v47  ;;  %v1049_v62 = vmul.f32 0.015625, %v1046_v51  ;;  %v1048_v63 = vmul.f32 0.015625, %v1043_v52 }
  0xee   : > { %v2623_v11 = vpack.c.bf16 %v738_v37, %v737_v55  ;;  %v717_v13 = vmul.f32 %v2507_v1, %v695_v50  ;;  %v740_v18 = vadd.f32 %v2514_v25, %v718_v56 }
  0xef   : > { %2087 = vrsqrt.f32 %v668_v58  ;;  %v1061_v22 = vmul.f32 %v1049_v62, %v1049_v62  ;;  %v1060_v23 = vmul.f32 %v1048_v63, %v1048_v63  ;;  %v1065_v61 = vsub.f32 %v2461_v6, %v1049_v62 }
  0xf0   : > { %2089 = vrsqrt.f32 %v667_v59  ;;  %1850 = vmatprep.mubr.msk.bf16.mxu0 %vm459_vm0, %v2623_v11  ;;  %v1057_v16 = vpop.xlane.xlu1 %1056  ;;  %v1054_v60 = vpop.xlane.xlu0 %1053  ;;  %v739_v30 = vadd.f32 %v2514_v25, %v717_v13  ;;  %v1064_v5 = vsub.f32 %v2463_v7, %v1048_v63 }
  0xf1   : > { %v1059_v31 = vmul.f32 0.015625, %v1057_v16  ;;  %v1058_v34 = vmul.f32 0.015625, %v1054_v60 }
  0xf2   : > { %v750_v35 = vpack.c.bf16 %v740_v18, %v739_v30 }
  0xf3   : > { %v1063_v0 = vsub.f32 %v1059_v31, %v1061_v22  ;;  %v1062_v32 = vsub.f32 %v1058_v34, %v1060_v23 }
  0xf4   : > { %1851 = vmatmul.mubr.msk.bf16.gmra.mrb[8].mxu0 %vm459_vm0, %v750_v35 }
  0xf5   : > { %v2084_v26 = vpop.eup %2083  ;;  %v1067_v10 = vadd.f32 1e-05, %v1063_v0  ;;  %v1066_v38 = vadd.f32 1e-05, %v1062_v32  ;;  %1886 = vmatprep.mubr.msk.bf16.mxu0 %vm2192_vm2, %v2191_v14 }
  0xf6   : > { %v2086_v39 = vpop.eup %2085  ;;  %v698_v40 = vmul.f32 %v2084_v26, %v650_v9 }
  0xf7   : > { %2091 = vrsqrt.f32 %v1067_v10  ;;  %v697_v41 = vmul.f32 %v2086_v39, %v649_v33 }
  0xf8   : > { %2093 = vrsqrt.f32 %v1066_v38  ;;  %v720_v48 = vmul.f32 %v2507_v1, %v698_v40 }
  0xf9   : > { %v2088_v24 = vpop.eup %2087  ;;  %v719_v28 = vmul.f32 %v2507_v1, %v697_v41 }
  0xfa   : > { %v2090_v20 = vpop.eup %2089  ;;  %v742_v3 = vadd.f32 %v2514_v25, %v720_v48  ;;  %v700_v43 = vmul.f32 %v2088_v24, %v652_v42 }
  0xfb   : > { %v741_v2 = vadd.f32 %v2514_v25, %v719_v28  ;;  %v699_v27 = vmul.f32 %v2090_v20, %v651_v49 }
  0xfc   : > { %v722_v44 = vmul.f32 %v2507_v1, %v700_v43 }
  0xfd   : > { %v751_v21 = vpack.c.bf16 %v742_v3, %v741_v2  ;;  %v721_v53 = vmul.f32 %v2507_v1, %v699_v27  ;;  %v2053_v1 = vld [vmem:[%s2935_s8 + $0x8] sm:$0xff]  }
  0xfe   : > { %v744_v17 = vadd.f32 %v2514_v25, %v722_v44 }
  0xff   : > { %1854 = vmatprep.mubr.msk.bf16.mxu1 %vm459_vm0, %v751_v21  ;;  %v743_v54 = vadd.f32 %v2514_v25, %v721_v53  ;;  %v1750_v25 = vld [vmem:[%s2932_s5] ss:$0 sm:$0xff] }
 0x101   : > { %v2092_v36 = vpop.eup %2091  ;;  %v752_v45 = vpack.c.bf16 %v744_v17, %v743_v54 }
 0x102   : > { %v2094_v37 = vpop.eup %2093  ;;  %v1071_v19 = vmul.f32 %v2092_v36, %v1065_v61 }
 0x103   : > { %v1070_v46 = vmul.f32 %v2094_v37, %v1064_v5  ;;  %1855 = vmatmul.mubr.msk.bf16.vlgmr.msra.gmra.mrb[0].mxu1 %vm459_vm0, %v752_v45 }
 0x104   : > { %v1079_v6 = vmul.f32 %v1749_v4, %v1071_v19  ;;  %1859 = vmatpush3.bf16.msra.mxu1 %v2479_v15  ;;  %1862 = vmatprep.mubr.msk.bf16.mxu1 %vm459_vm0, %v2527_v57 }
 0x105   : > { %v1078_v7 = vmul.f32 %v1749_v4, %v1070_v46  ;;  %1860 = vmatprep.subr.bf16.mxu1 %v2053_v1 }
 0x106   : > { %v1087_v47 = vadd.f32 %v1750_v25, %v1079_v6 }
 0x107   : > { %v1086_v50 = vadd.f32 %v1750_v25, %v1078_v7 }
 0x108   : > { %1861 = vmatpush3.bf16.msra.mxu1 %v2053_v1 }
 0x109   : > { %v1088_v51 = vpack.c.bf16 %v1087_v47, %v1086_v50  ;;  %1890 = vmatprep.subr.bf16.mxu1 %v2191_v14 }
 0x10b   : > { %1863 = vmatmul.mubr.msk.bf16.vlgmr.msra.gmra.mrb[4].mxu1 %vm459_vm0, %v2541_v12  ;;  %1887 = vmatmul.mubr.msk.bf16.vlgmr.msra.gmra.mrb[12].mxu0 %vm898_vm1, %v1088_v51 }
 0x10c   : > { %1866 = vmatprep.mubr.msk.bf16.mxu1 %vm459_vm0, %v2581_v8  ;;  %1926 = vmatprep.mubr.msk.bf16.mxu0 %vm2192_vm2, %v2191_v14 }
 0x113   : > { %1867 = vmatmul.mubr.msk.bf16.gmra.mrb[8].mxu1 %vm459_vm0, %v2593_v29 }
 0x114   : > { %1870 = vmatprep.mubr.msk.bf16.mxu1 %vm459_vm0, %v2623_v11 }
 0x11b   : > { %1871 = vmatmul.mubr.msk.bf16.gmra.mrb[12].mxu1 %vm459_vm0, %v750_v35 }
 0x11c   : > { %1874 = vmatprep.mubr.msk.bf16.mxu1 %vm459_vm0, %v751_v21 }
 0x123   : > { %1875 = vmatmul.mubr.msk.bf16.gmra.mrb[16].mxu1 %vm459_vm0, %v752_v45 }
 0x124   : > { %1906 = vmatprep.mubr.msk.bf16.mxu1 %vm2192_vm2, %v2191_v14 }
 0x1a6   : > { %v1844_v15 = vpop.f32.mrb[0].mxu0 }
 0x1a7   : > { %v827_v57 = vpop.f32.mrb[1].mxu0 }
 0x1a8   : > { %v1845_v12 = vpop.f32.mrb[2].mxu0 }
 0x1a9   : > { %v891_v8 = vpack.c.bf16 %v1845_v12, %v1844_v15  ;;  %v830_v52 = vpop.f32.mrb[3].mxu0 }
 0x1aa   : > { %v890_v55 = vpack.c.bf16 %v830_v52, %v827_v57 }
 0x1ab   : > { %900 = vst.msk [vmem:[#allocation2 + $0x8] sm:$0xff] %vm898_vm1, %v891_v8 }
 0x1ac   : > { %899 = vst.msk [vmem:[#allocation2] sm:$0xff] %vm898_vm1, %v890_v55 }
 0x1b2   : > { %v2689_v13 = vld [vmem:[#allocation2 + $0x8] sm:$0xff] }
 0x1b3   : > { %v2684_v29 = vld [vmem:[#allocation2] sm:$0xff]  ;;  %v1195_v22 = vsel %vm459_vm0, %v2689_v13, 0 }
 0x1b4   : > { %v1192_v56 = vsel %vm459_vm0, %v2684_v29, 0 }
 0x1b5   : > { %1891 = vmatpush3.bf16.xpose.msra.mxu1 %v1192_v56 }
 0x1b6   : > { %v1848_v58 = vpop.f32.mrb[4].mxu0  ;;  %1892 = vmatprep.subr.bf16.mxu1 %v2191_v14 }
 0x1b7   : > { %v843_v59 = vpop.f32.mrb[5].mxu0 }
 0x1b8   : > { %v1849_v62 = vpop.f32.mrb[6].mxu0 }
 0x1b9   : > { %v893_v63 = vpack.c.bf16 %v1849_v62, %v1848_v58  ;;  %v846_v11 = vpop.f32.mrb[7].mxu0 }
 0x1ba   : > { %v892_v18 = vpack.c.bf16 %v846_v11, %v843_v59 }
 0x1bb   : > { %902 = vst.msk [vmem:[#allocation2 + $0x18] sm:$0xff] %vm898_vm1, %v893_v63 }
 0x1bc   : > { %901 = vst.msk [vmem:[#allocation2 + $0x10] sm:$0xff] %vm898_vm1, %v892_v18 }
 0x1bd   : > { %1893 = vmatpush3.bf16.xpose.msra.mxu1 %v1195_v22 }
 0x1be   : > { %1894 = vmatprep.subr.bf16.mxu1 %v2191_v14 }
 0x1c2   : > { %v2701_v0 = vld [vmem:[#allocation2 + $0x18] sm:$0xff] }
 0x1c3   : > { %v2696_v23 = vld [vmem:[#allocation2 + $0x10] sm:$0xff]  ;;  %v1201_v9 = vsel %vm459_vm0, %v2701_v0, 0 }
 0x1c4   : > { %v1198_v16 = vsel %vm459_vm0, %v2696_v23, 0 }
 0x1c5   : > { %1895 = vmatpush3.bf16.xpose.msra.mxu1 %v1198_v16 }
 0x1c6   : > { %1896 = vmatprep.subr.bf16.mxu1 %v2191_v14 }
 0x1c7   : > { %v1852_v60 = vpop.f32.mrb[8].mxu0 }
 0x1c8   : > { %v859_v30 = vpop.f32.mrb[9].mxu0 }
 0x1c9   : > { %v1853_v31 = vpop.f32.mrb[10].mxu0 }
 0x1ca   : > { %v895_v34 = vpack.c.bf16 %v1853_v31, %v1852_v60  ;;  %v862_v35 = vpop.f32.mrb[11].mxu0 }
 0x1cb   : > { %v894_v32 = vpack.c.bf16 %v862_v35, %v859_v30  ;;  %v1184_v30 = vlaneseq }
 0x1cc   : > { %904 = vst.msk [vmem:[#allocation2 + $0x28] sm:$0xff] %vm898_vm1, %v895_v34 }
 0x1cd   : > { %903 = vst.msk [vmem:[#allocation2 + $0x20] sm:$0xff] %vm898_vm1, %v894_v32  ;;  %1897 = vmatpush3.bf16.xpose.msra.mxu1 %v1201_v9  ;;  %v2776_v31 = vand.u32 127, %v1184_v30 }
 0x1ce   : > { %1898 = vmatprep.subr.bf16.mxu1 %v2191_v14 }
 0x1cf   : > { %vm1186_vm3 = vcmp.lt.s32.totalorder %v2776_v31, 8 }
 0x1d3   : > { %v2713_v48 = vld [vmem:[#allocation2 + $0x28] sm:$0xff] }
 0x1d4   : > { %v2708_v26 = vld [vmem:[#allocation2 + $0x20] sm:$0xff]  ;;  %v1207_v24 = vsel %vm459_vm0, %v2713_v48, 0 }
 0x1d5   : > { %v1204_v33 = vsel %vm459_vm0, %v2708_v26, 0 }
 0x1d6   : > { %1899 = vmatpush3.bf16.xpose.msra.mxu1 %v1204_v33  ;;  %v1856_v10 = vpop.f32.mrb[0].mxu1 }
 0x1d7   : > { %v875_v38 = vpop.f32.mrb[1].mxu1  ;;  %1900 = vmatprep.subr.bf16.mxu1 %v2191_v14 }
 0x1d8   : > { %v1857_v39 = vpop.f32.mrb[2].mxu1 }
 0x1d9   : > { %v897_v40 = vpack.c.bf16 %v1857_v39, %v1856_v10  ;;  %v878_v41 = vpop.f32.mrb[3].mxu1 }
 0x1da   : > { %v896_v42 = vpack.c.bf16 %v878_v41, %v875_v38 }
 0x1db   : > { %906 = vst.msk [vmem:[#allocation2 + $0x38] sm:$0xff] %vm898_vm1, %v897_v40 }
 0x1dc   : > { %905 = vst.msk [vmem:[#allocation2 + $0x30] sm:$0xff] %vm898_vm1, %v896_v42 }
 0x1de   : > { %1901 = vmatpush3.bf16.xpose.msra.mxu1 %v1207_v24  ;;  %v1864_v49 = vpop.f32.mrb[4].mxu1  ;;  %v1158_v28 = vpop.f32.mrb[12].mxu0 }
 0x1df   : > { %v957_v20 = vpop.f32.mrb[5].mxu1  ;;  %v1888_v3 = vpop.f32.mrb[13].mxu0  ;;  %1902 = vmatprep.subr.bf16.mxu1 %v2191_v14  ;;  %v1165_v27 = vmul.f32 0.17677669, %v1158_v28 }
 0x1e0   : > { %v1865_v43 = vpop.f32.mrb[6].mxu1  ;;  %v1161_v2 = vpop.f32.mrb[14].mxu0 }
 0x1e1   : > { %v1021_v44 = vpack.c.bf16 %v1865_v43, %v1864_v49  ;;  %v1166_v21 = vmul.f32 0.17677669, %v1161_v2  ;;  %v960_v53 = vpop.f32.mrb[7].mxu1  ;;  %v1889_v17 = vpop.f32.mrb[15].mxu0 }
 0x1e2   : > { %v1020_v54 = vpack.c.bf16 %v960_v53, %v957_v20  ;;  %v2729_v46 = vld [vmem:[#allocation2 + $0x38] sm:$0xff] }
 0x1e3   : > { %1029 = vst.msk [vmem:[#allocation3 + $0x8] sm:$0xff] %vm898_vm1, %v1021_v44  ;;  %v2721_v61 = vpack.c.bf16 %v1166_v21, %v1165_v27  ;;  %v2723_v36 = vld [vmem:[#allocation2 + $0x30] sm:$0xff]  ;;  %v1213_v7 = vsel %vm459_vm0, %v2729_v46, 0 }
 0x1e4   : > { %1028 = vst.msk [vmem:[#allocation3] sm:$0xff] %vm898_vm1, %v1020_v54  ;;  %v1210_v5 = vsel %vm459_vm0, %v2723_v36, 0 }
 0x1e6   : > { %1903 = vmatpush3.bf16.xpose.msra.mxu1 %v1210_v5  ;;  %v1868_v4 = vpop.f32.mrb[8].mxu1 }
 0x1e7   : > { %v973_v45 = vpop.f32.mrb[9].mxu1  ;;  %1904 = vmatprep.subr.bf16.mxu1 %v2191_v14 }
 0x1e8   : > { %v1869_v1 = vpop.f32.mrb[10].mxu1 }
 0x1e9   : > { %v1023_v37 = vpack.c.bf16 %v1869_v1, %v1868_v4  ;;  %v976_v19 = vpop.f32.mrb[11].mxu1 }
 0x1ea   : > { %v1022_v25 = vpack.c.bf16 %v976_v19, %v973_v45  ;;  %v2739_v51 = vld [vmem:[#allocation3 + $0x8] sm:$0xff] }
 0x1eb   : > { %1031 = vst.msk [vmem:[#allocation3 + $0x18] sm:$0xff] %vm898_vm1, %v1023_v37  ;;  %v2732_v6 = vld [vmem:[#allocation3] sm:$0xff] }
 0x1ec   : > { %1030 = vst.msk [vmem:[#allocation3 + $0x10] sm:$0xff] %vm898_vm1, %v1022_v25  ;;  %1911 = vmatpush3.bf16.msra.mxu0 %v2732_v6 }
 0x1ed   : > { %1912 = vmatprep.subr.bf16.mxu0 %v2191_v14 }
 0x1ee   : > { %1905 = vmatpush3.bf16.xpose.msra.mxu1 %v1213_v7  ;;  %v1872_v47 = vpop.f32.mrb[12].mxu1 }
 0x1ef   : > { %v989_v50 = vpop.f32.mrb[13].mxu1  ;;  %1950 = vmatprep.subr.bf16.mxu1 %v2191_v14 }
 0x1f0   : > { %v1873_v15 = vpop.f32.mrb[14].mxu1  ;;  %1913 = vmatpush3.bf16.msra.mxu0 %v2739_v51 }
 0x1f1   : > { %v1025_v57 = vpack.c.bf16 %v1873_v15, %v1872_v47  ;;  %v992_v12 = vpop.f32.mrb[15].mxu1  ;;  %1914 = vmatprep.subr.bf16.mxu0 %v2191_v14 }
 0x1f2   : > { %v1024_v8 = vpack.c.bf16 %v992_v12, %v989_v50  ;;  %v2754_v58 = vld [vmem:[#allocation3 + $0x18] sm:$0xff] }
 0x1f3   : > { %1033 = vst.msk [vmem:[#allocation3 + $0x28] sm:$0xff] %vm898_vm1, %v1025_v57  ;;  %v2745_v52 = vld [vmem:[#allocation3 + $0x10] sm:$0xff] }
 0x1f4   : > { %1032 = vst.msk [vmem:[#allocation3 + $0x20] sm:$0xff] %vm898_vm1, %v1024_v8  ;;  %1915 = vmatpush3.bf16.msra.mxu0 %v2745_v52 }
 0x1f5   : > { %1907 = vmatmul.mubr.msk.bf16.vlgmr.msra.gmra.mrb[20].mxu1 %vm459_vm0, %v2721_v61  ;;  %1916 = vmatprep.subr.bf16.mxu0 %v2191_v14 }
 0x1f6   : > { %v1876_v55 = vpop.f32.mrb[16].mxu1  ;;  %1966 = vmatprep.mubr.msk.bf16.mxu1 %vm2192_vm2, %v2191_v14 }
 0x1f7   : > { %v1005_v56 = vpop.f32.mrb[17].mxu1 }
 0x1f8   : > { %v1877_v59 = vpop.f32.mrb[18].mxu1  ;;  %1917 = vmatpush3.bf16.msra.mxu0 %v2754_v58 }
 0x1f9   : > { %v1027_v62 = vpack.c.bf16 %v1877_v59, %v1876_v55  ;;  %v1008_v63 = vpop.f32.mrb[19].mxu1  ;;  %1918 = vmatprep.subr.bf16.mxu0 %v2191_v14 }
 0x1fa   : > { %v1026_v11 = vpack.c.bf16 %v1008_v63, %v1005_v56  ;;  %v2764_v22 = vld [vmem:[#allocation3 + $0x28] sm:$0xff] }
 0x1fb   : > { %1035 = vst.msk [vmem:[#allocation3 + $0x38] sm:$0xff] %vm898_vm1, %v1027_v62  ;;  %v2759_v18 = vld [vmem:[#allocation3 + $0x20] sm:$0xff] }
 0x1fc   : > { %1034 = vst.msk [vmem:[#allocation3 + $0x30] sm:$0xff] %vm898_vm1, %v1026_v11  ;;  %1919 = vmatpush3.bf16.msra.mxu0 %v2759_v18 }
 0x1fd   : > { %1920 = vmatprep.subr.bf16.mxu0 %v2191_v14 }
 0x200   : > { %1921 = vmatpush3.bf16.msra.mxu0 %v2764_v22 }
 0x201   : > { %1922 = vmatprep.subr.bf16.mxu0 %v2191_v14 }
 0x202   : > { %v2772_v60 = vld [vmem:[#allocation3 + $0x38] sm:$0xff] }
 0x203   : > { %v2768_v16 = vld [vmem:[#allocation3 + $0x30] sm:$0xff] }
 0x204   : > { %1923 = vmatpush3.bf16.msra.mxu0 %v2768_v16 }
 0x205   : > { %1924 = vmatprep.subr.bf16.mxu0 %v2191_v14 }
 0x208   : > { %1925 = vmatpush3.bf16.msra.mxu0 %v2772_v60 }
 0x209   : > { %1930 = vmatprep.subr.bf16.mxu0 %v2191_v14 }
 0x2c8   : > { %v1249_v34 = vpop.f32.mrb[20].mxu1 }
 0x2c9   : > { %v1908_v35 = vpop.f32.mrb[21].mxu1  ;;  %v1258_v32 = vsel %vm1186_vm3, %v1249_v34, -1e+30 }
 0x2ca   : > { %1260 = vmax.xlane.f32.xlu0 %v1258_v32  ;;  %v1252_v9 = vpop.f32.mrb[22].mxu1 }
 0x2cb   : > { %v1909_v33 = vpop.f32.mrb[23].mxu1  ;;  %v1259_v10 = vsel %vm1186_vm3, %v1252_v9, -1e+30 }
 0x2cc   : > { %1262 = vmax.xlane.f32.xlu1 %v1259_v10 }
 0x357   : > { %v1261_v38 = vpop.xlane.xlu0 %1260 }
 0x358   : > { %v1264_v39 = vsub.f32 %v1258_v32, %v1261_v38 }
 0x359   : > { %v1263_v40 = vpop.xlane.xlu1 %1262 }
 0x35a   : > { %v1266_v41 = vmul.f32 1.442695, %v1264_v39  ;;  %v1265_v42 = vsub.f32 %v1259_v10, %v1263_v40 }
 0x35c   : > { %2095 = vpow2.f32 %v1266_v41  ;;  %v1268_v24 = vmul.f32 1.442695, %v1265_v42  ;;  %v2056_v41 = vld [vmem:[%s2936_s9 + $0x8] sm:$0xff]   ;;  %v2057_v42 = vld [vmem:[%s2936_s9 + $0x10] sm:$0xff]  }
 0x35e   : > { %2097 = vpow2.f32 %v1268_v24  ;;  %v2058_v24 = vld [vmem:[%s2936_s9 + $0x18] sm:$0xff]  }
 0x366   : > { %v2096_v49 = vpop.eup %2095 }
 0x367   : > { %1270 = vadd.xlane.f32.xlu0 %v2096_v49 }
 0x368   : > { %v2098_v28 = vpop.eup %2097 }
 0x369   : > { %1272 = vadd.xlane.f32.xlu1 %v2098_v28 }
 0x37a   : > { %1335 = vrot.lane.b32.xlu1 %v2689_v13, %s2193_s24 }
 0x37d   : > { %1333 = vrot.lane.b32.xlu0 %v2684_v29, %s2193_s24 }
 0x37e   : > { %1337 = vrot.lane.b32.xlu1 %v2696_v23, %s2193_s24 }
 0x381   : > { %1341 = vrot.lane.b32.xlu0 %v2708_v26, %s2193_s24 }
 0x382   : > { %1339 = vrot.lane.b32.xlu1 %v2701_v0, %s2193_s24 }
 0x385   : > { %1345 = vrot.lane.b32.xlu0 %v2723_v36, %s2193_s24 }
 0x386   : > { %1343 = vrot.lane.b32.xlu1 %v2713_v48, %s2193_s24 }
 0x389   : > { %1323 = vrot.lane.b32.xlu0 %v2721_v61, %s2193_s24 }
 0x38a   : > { %1347 = vrot.lane.b32.xlu1 %v2729_v46, %s2193_s24 }
 0x3f4   : > { %v1271_v29 = vpop.xlane.xlu0 %1270 }
 0x3f5   : > { %2099 = vrcp.f32 %v1271_v29 }
 0x3f6   : > { %v1273_v13 = vpop.xlane.xlu1 %1272 }
 0x3f7   : > { %2101 = vrcp.f32 %v1273_v13 }
 0x3f8   : > { %v1334_v3 = vpop.permute.xlu0 %1333 }
 0x3f9   : > { %v1353_v2 = vsel %vm459_vm0, %v1334_v3, 0 }
 0x3fa   : > { %v1336_v48 = vpop.permute.xlu1 %1335 }
 0x3fb   : > { %v1356_v27 = vsel %vm459_vm0, %v1336_v48, 0 }
 0x3fc   : > { %v1342_v54 = vpop.permute.xlu0 %1341 }
 0x3fd   : > { %v1365_v61 = vsel %vm459_vm0, %v1342_v54, 0 }
 0x3fe   : > { %v1338_v44 = vpop.permute.xlu1 %1337 }
 0x3ff   : > { %v2100_v23 = vpop.eup %2099  ;;  %v1359_v21 = vsel %vm459_vm0, %v1338_v44, 0 }
 0x400   : > { %v1276_v20 = vmul.f32 %v2100_v23, %v2096_v49  ;;  %v1346_v4 = vpop.permute.xlu0 %1345 }
 0x401   : > { %v2102_v26 = vpop.eup %2101  ;;  %v1371_v45 = vsel %vm459_vm0, %v1346_v4, 0 }
 0x402   : > { %v1277_v0 = vmul.f32 %v2102_v26, %v2098_v28  ;;  %v1340_v53 = vpop.permute.xlu1 %1339 }
 0x403   : > { %v1362_v17 = vsel %vm459_vm0, %v1340_v53, 0 }
 0x404   : > { %v1278_v43 = vpack.c.bf16 %v1277_v0, %v1276_v20  ;;  %v1324_v19 = vpop.permute.xlu0 %1323 }
 0x406   : > { %1927 = vmatmul.mubr.bf16.vlgmr.msra.gmra.mrb[16].mxu0 %v1278_v43  ;;  %v1344_v36 = vpop.permute.xlu1 %1343 }
 0x407   : > { %1931 = vmatpush3.bf16.xpose.msra.mxu0 %v1353_v2  ;;  %1946 = vmatprep.mubr.msk.bf16.mxu0 %vm2192_vm2, %v2191_v14  ;;  %v1368_v5 = vsel %vm459_vm0, %v1344_v36, 0 }
 0x408   : > { %1932 = vmatprep.subr.bf16.mxu0 %v2191_v14 }
 0x40a   : > { %v1348_v1 = vpop.permute.xlu1 %1347 }
 0x40b   : > { %v1374_v37 = vsel %vm459_vm0, %v1348_v1, 0 }
 0x40f   : > { %1933 = vmatpush3.bf16.xpose.msra.mxu0 %v1356_v27 }
 0x410   : > { %1934 = vmatprep.subr.bf16.mxu0 %v2191_v14 }
 0x417   : > { %1935 = vmatpush3.bf16.xpose.msra.mxu0 %v1359_v21 }
 0x418   : > { %1936 = vmatprep.subr.bf16.mxu0 %v2191_v14 }
 0x41f   : > { %1937 = vmatpush3.bf16.xpose.msra.mxu0 %v1362_v17 }
 0x420   : > { %1938 = vmatprep.subr.bf16.mxu0 %v2191_v14 }
 0x427   : > { %1939 = vmatpush3.bf16.xpose.msra.mxu0 %v1365_v61 }
 0x428   : > { %1940 = vmatprep.subr.bf16.mxu0 %v2191_v14 }
 0x42f   : > { %1941 = vmatpush3.bf16.xpose.msra.mxu0 %v1368_v5 }
 0x430   : > { %1942 = vmatprep.subr.bf16.mxu0 %v2191_v14 }
 0x437   : > { %1943 = vmatpush3.bf16.xpose.msra.mxu0 %v1371_v45 }
 0x438   : > { %1944 = vmatprep.subr.bf16.mxu0 %v2191_v14 }
 0x43f   : > { %1945 = vmatpush3.bf16.xpose.msra.mxu0 %v1374_v37 }
 0x446   : > { %1947 = vmatmul.mubr.msk.bf16.vlgmr.msra.gmra.mrb[20].mxu0 %vm459_vm0, %v1324_v19 }
 0x4d9   : > { %v1313_v25 = vpop.f32.mrb[16].mxu0 }
 0x4da   : > { %1320 = vst.msk [vmem:[#allocation4] sm:$0xff] %vm459_vm0, %v1313_v25  ;;  %v1928_v46 = vpop.f32.mrb[17].mxu0 }
 0x4db   : > { %v1316_v7 = vpop.f32.mrb[18].mxu0 }
 0x4dc   : > { %1321 = vst.msk [vmem:[#allocation4 + $0x8] sm:$0xff] %vm459_vm0, %v1316_v7  ;;  %v1929_v47 = vpop.f32.mrb[19].mxu0 }
 0x519   : > { %v1410_v50 = vpop.f32.mrb[20].mxu0 }
 0x51a   : > { %v1948_v15 = vpop.f32.mrb[21].mxu0  ;;  %v1417_v57 = vsel %vm1186_vm3, %v1410_v50, -1e+30 }
 0x51b   : > { %1419 = vmax.xlane.f32.xlu1 %v1417_v57  ;;  %v1413_v12 = vpop.f32.mrb[22].mxu0 }
 0x51c   : > { %v1949_v8 = vpop.f32.mrb[23].mxu0  ;;  %v1418_v55 = vsel %vm1186_vm3, %v1413_v12, -1e+30 }
 0x51d   : > { %1421 = vmax.xlane.f32.xlu0 %v1418_v55 }
 0x52c   : > { %1448 = vrot.lane.b32.xlu1 %v2739_v51, %s2193_s24 }
 0x530   : > { %1454 = vrot.lane.b32.xlu1 %v2759_v18, %s2193_s24 }
 0x533   : > { %1446 = vrot.lane.b32.xlu0 %v2732_v6, %s2193_s24 }
 0x537   : > { %1450 = vrot.lane.b32.xlu0 %v2745_v52, %s2193_s24 }
 0x53b   : > { %1452 = vrot.lane.b32.xlu0 %v2754_v58, %s2193_s24 }
 0x53f   : > { %1456 = vrot.lane.b32.xlu0 %v2764_v22, %s2193_s24 }
 0x543   : > { %1460 = vrot.lane.b32.xlu0 %v2772_v60, %s2193_s24 }
 0x5a8   : > { %v1420_v56 = vpop.xlane.xlu1 %1419 }
 0x5a9   : > { %v1423_v51 = vsub.f32 %v1417_v57, %v1420_v56 }
 0x5aa   : > { %v1422_v59 = vpop.xlane.xlu0 %1421 }
 0x5ab   : > { %v1425_v62 = vmul.f32 1.442695, %v1423_v51  ;;  %v1424_v63 = vsub.f32 %v1418_v55, %v1422_v59 }
 0x5ac   : > { %v1449_v52 = vpop.permute.xlu1 %1448 }
 0x5ad   : > { %2103 = vpow2.f32 %v1425_v62  ;;  %v1427_v11 = vmul.f32 1.442695, %v1424_v63 }
 0x5ae   : > { %v1447_v6 = vpop.permute.xlu0 %1446 }
 0x5af   : > { %1951 = vmatpush3.bf16.msra.mxu1 %v1447_v6  ;;  %2105 = vpow2.f32 %v1427_v11 }
 0x5b0   : > { %1952 = vmatprep.subr.bf16.mxu1 %v2191_v14  ;;  %v1455_v30 = vpop.permute.xlu1 %1454 }
 0x5b2   : > { %v1451_v58 = vpop.permute.xlu0 %1450 }
 0x5b3   : > { %1953 = vmatpush3.bf16.msra.mxu1 %v1449_v52 }
 0x5b4   : > { %1954 = vmatprep.subr.bf16.mxu1 %v2191_v14 }
 0x5b6   : > { %v1453_v22 = vpop.permute.xlu0 %1452 }
 0x5b7   : > { %v2104_v18 = vpop.eup %2103  ;;  %1955 = vmatpush3.bf16.msra.mxu1 %v1451_v58 }
 0x5b8   : > { %1429 = vadd.xlane.f32.xlu1 %v2104_v18  ;;  %1956 = vmatprep.subr.bf16.mxu1 %v2191_v14 }
 0x5b9   : > { %v2106_v60 = vpop.eup %2105 }
 0x5ba   : > { %v1457_v31 = vpop.permute.xlu0 %1456 }
 0x5bb   : > { %1957 = vmatpush3.bf16.msra.mxu1 %v1453_v22 }
 0x5bc   : > { %1431 = vadd.xlane.f32.xlu1 %v2106_v60  ;;  %1958 = vmatprep.subr.bf16.mxu1 %v2191_v14 }
 0x5be   : > { %v1461_v9 = vpop.permute.xlu0 %1460 }
 0x5bf   : > { %1959 = vmatpush3.bf16.msra.mxu1 %v1455_v30 }
 0x5c0   : > { %1960 = vmatprep.subr.bf16.mxu1 %v2191_v14 }
 0x5c3   : > { %1961 = vmatpush3.bf16.msra.mxu1 %v1457_v31 }
 0x5c4   : > { %1962 = vmatprep.subr.bf16.mxu1 %v2191_v14 }
 0x5cd   : > { %1458 = vrot.lane.b32.xlu1 %v2768_v16, %s2193_s24  ;;  %v2055_v16 = vld [vmem:[%s2936_s9] sm:$0xff]   ;;  %s2194_s24 = smov 32  }
 0x645   : > { %v1430_v34 = vpop.xlane.xlu1 %1429 }
 0x646   : > { %2107 = vrcp.f32 %v1430_v34 }
 0x649   : > { %v1432_v35 = vpop.xlane.xlu1 %1431 }
 0x64a   : > { %2109 = vrcp.f32 %v1432_v35 }
 0x64d   : > { %v1459_v32 = vpop.permute.xlu1 %1458 }
 0x64e   : > { %1963 = vmatpush3.bf16.msra.mxu1 %v1459_v32 }
 0x64f   : > { %1964 = vmatprep.subr.bf16.mxu1 %v2191_v14 }
 0x650   : > { %v2108_v33 = vpop.eup %2107 }
 0x651   : > { %v1435_v38 = vmul.f32 %v2108_v33, %v2104_v18 }
 0x652   : > { %1965 = vmatpush3.bf16.msra.mxu1 %v1461_v9 }
 0x653   : > { %1970 = vmatprep.subr.bf16.mxu1 %v2191_v14 }
 0x654   : > { %v2110_v10 = vpop.eup %2109 }
 0x655   : > { %v1436_v39 = vmul.f32 %v2110_v10, %v2106_v60 }
 0x657   : > { %v1437_v40 = vpack.c.bf16 %v1436_v39, %v1435_v38 }
 0x659   : > { %1967 = vmatmul.mubr.bf16.vlgmr.msra.gmra.mrb[24].mxu1 %v1437_v40 }
 0x65a   : > { %1978 = vmatprep.mubr.msk.bf16.mxu1 %vm2192_vm2, %v2191_v14  ;;  %1971 = vmatpush3.bf16.msra.mxu1 %v2055_v16 }
 0x65b   : > { %1972 = vmatprep.subr.bf16.mxu1 %v2191_v14 }
 0x65e   : > { %1973 = vmatpush3.bf16.msra.mxu1 %v2056_v41 }
 0x65f   : > { %1974 = vmatprep.subr.bf16.mxu1 %v2191_v14 }
 0x662   : > { %1975 = vmatpush3.bf16.msra.mxu1 %v2057_v42 }
 0x663   : > { %1976 = vmatprep.subr.bf16.mxu1 %v2191_v14  ;;  %v1758_v14 = vld [vmem:[%s2937_s10] ss:$0 sm:$0xff] }
 0x666   : > { %1977 = vmatpush3.bf16.msra.mxu1 %v2058_v24 }
 0x72c   : > { %v1504_v49 = vpop.f32.mrb[24].mxu1 }
 0x72d   : > { %1513 = vrot.lane.b32.xlu1 %v1504_v49, %s2194_s24  ;;  %v1968_v28 = vpop.f32.mrb[25].mxu1 }
 0x72e   : > { %v1507_v29 = vpop.f32.mrb[26].mxu1 }
 0x72f   : > { %1515 = vrot.lane.b32.xlu0 %v1507_v29, %s2194_s24  ;;  %v1969_v13 = vpop.f32.mrb[27].mxu1 }
 0x79f   : > { %v1514_v23 = vpop.permute.xlu1 %1513 }
 0x7a0   : > { %1520 = vst.msk [vmem:[#allocation4] sm:$0xff] %vm1519_vm4, %v1514_v23 }
 0x7a1   : > { %v1516_v26 = vpop.permute.xlu0 %1515 }
 0x7a2   : > { %1521 = vst.msk [vmem:[#allocation4 + $0x8] sm:$0xff] %vm1519_vm4, %v1516_v26 }
 0x7a7   : > { %v1522_v20 = vld [vmem:[#allocation4] sm:$0xff] }
 0x7a9   : > { %v1523_v0 = vld [vmem:[#allocation4 + $0x8] sm:$0xff] }
 0x7aa   : > { %v1524_v3 = vpack.c.bf16 %v1523_v0, %v1522_v20 }
 0x7ac   : > { %1979 = vmatmul.mubr.msk.bf16.vlgmr.msra.gmra.mrb[28].mxu1 %vm898_vm1, %v1524_v3 }
 0x87f   : > { %v1601_v43 = vpop.f32.mrb[28].mxu1 }
 0x880   : > { %v1602_v2 = vadd.f32 %v1758_v14, %v1601_v43  ;;  %v1980_v48 = vpop.f32.mrb[29].mxu1 }
 0x881   : > { %v1604_v27 = vpop.f32.mrb[30].mxu1 }
 0x882   : > { %1608 = vst.msk [vmem:[%s419_s15] sm:$0xff] %vm898_vm1, %v1602_v2  ;;  %v1605_v44 = vadd.f32 %v1758_v14, %v1604_v27  ;;  %v1981_v21 = vpop.f32.mrb[31].mxu1 }
 0x884   : > { %1609 = vst.msk [vmem:[%s419_s15 + $0x8] sm:$0xff] %vm898_vm1, %v1605_v44 }
 0x885   : > { %2124 = shalt.err (!%p2121_p5)
}
 0x886   : > { %s2125_s26 = scalar_lea.hbm %s2877_s0, 256  ;;  %s2129_s23 = scalar_lea.hbm %s2938_s11, 512 }
 0x887   : > { %p2126_p6 = scmp.ne.s32.totalorder %s2877_s0, %s2125_s26  ;;  %p2130_p10 = scmp.lt.u32.totalorder %s2877_s0, %s2938_s11 }
 0x888   : > { %p2131_p11 = scmp.lt.u32.totalorder %s2129_s23, %s2125_s26  ;;  %p2133_p13 = scmp.lt.u32.totalorder %s2125_s26, %s2877_s0 }
 0x889   : > { %p2127_p7 = pnand %p2126_p6, %p2298_p4 }
 0x88a   : > { %p2132_p12 = por %p2131_p11, %p2130_p10 }
 0x88b   : > { %p2128_p9 = pneg %p2127_p7 }
 0x88c   : > { %p2134_p0 = por %p2133_p13, %p2132_p12 }
 0x88e   : > { %p2135_p1 = pnand %p2134_p0, %p2128_p9 }
 0x890   : > { %2138 = shalt.err (!%p2135_p1)
}
 0x891   : > { %s2196_s1 = smov 128   ;;  %s2197_s28 = smov 8  }
 0x892   : > { %1986 = dma.vmem_to_hbm [thread:$0]  (%p2298_p4), %s2872_s16, 256, %s2877_s0, %s2881_s20, %s2196_s1, %s2196_s1, %s2197_s28  }
 0x893 PF: > { %p1992_p2 = scmp.ge.s32.totalorder %s2189_s22, 2  ;;  %s1641_s14 = sand.u32 1, %s2169_s17  }
 0x894   : > { %s1642_s26 = scalar_lea.sflag [#allocation6], %s1641_s14 }
 0x895   : > { %p1989_p3 = pnand %p1992_p2, %p2305_p8 }
 0x897   : > { %2164 = dma.done.wait (!%p1989_p3), %s1642_s26, 256  }
 0x898   : > { %2166 = vsyncadd (!%p1989_p3), %s1642_s26, 4294967040  ;;  %s24_s22 = sadd.s32 1, %s2189_s22   ;;  %s2945_s17 = smov %s2173_s18 }
 0x899   : > { %p21_p5 = scmp.ge.s32.totalorder %s24_s22, 4   ;;  %s2946_s18 = smov %s2177_s19 }
 0x89a   : > { %s2947_s19 = smov %s2311_s30  ;;  %s2948_s20 = smov %s2185_s21 }
 0x89b   : > { %s2949_s21 = smov %s2951_s25  ;;  %23 = sbr.rel (!%p21_p5) target bundleno = 7 (0x7), region = 106 }
 0x8a2   :  { %1647 = vsyncpa [#allocation6], 1 }
 0x8a3   :  { %1649 = vsyncpa [#allocation6 + $0x1], 1 }

</bundles_post_ra>
